<compile_context>
chip_gen: v7x
topology: tpu7x:2x2x1
jax: 0.10.0
libtpu: 0.0.40
codegen_flags: <defaults>
</compile_context>

<pallas_src>
import math
from functools import partial

import jax
import jax.numpy as jnp
import numpy as np
from jax.experimental import pallas as pl
from jax.experimental.pallas import tpu as pltpu

# torchvision vgg19 "features" configuration (conv channel counts / 'M' = maxpool)
VGG19_CFG = [64, 64, 'M', 128, 128, 'M', 256, 256, 256, 256, 'M',
             512, 512, 512, 512, 'M', 512, 512, 512, 512, 'M']

_VMEM_LIMIT = 64 * 1024 * 1024   # > v5e's 16 MiB default, <= v7x physical


# ----------------------------- Pallas kernels ------------------------------ #

def _epilogue_store(acc, o_ref, pool):
    """acc: (NB*H*W, tn) f32, rows ordered [nb][h][w]. ReLU (+2x2 maxpool), store."""
    NB, Ho, Wo, tn = o_ref.shape
    acc = jnp.maximum(acc, 0.0)
    if pool:
        # rows = ((nb*Ho + ho)*2 + hbit)*Wo*2 + wo*2 + wbit  ->  rank-5 split + max
        r = acc.reshape(NB * Ho, 2, Wo, 2, tn)
        acc = jnp.maximum(jnp.maximum(r[:, 0, :, 0, :], r[:, 0, :, 1, :]),
                          jnp.maximum(r[:, 1, :, 0, :], r[:, 1, :, 1, :]))
    o_ref[...] = acc.reshape(NB, Ho, Wo, tn).astype(o_ref.dtype)


def _conv3x3_taps_kernel(x_ref, w_ref, b_ref, o_ref, *, pool):
    """Fused Conv2d(3x3, pad=1) + bias + ReLU (+ optional 2x2 maxpool).

    x_ref: (NB, H+2, W+2, Cin) bf16 padded block
    w_ref: (9, Cin, tn)        bf16 tap-major weights (t = kh*3 + kw)
    b_ref: (1, tn)             f32
    o_ref: (NB, Ho, Wo, tn)    bf16
    """
    NB, Hp, Wp, cin = x_ref.shape
    H, W = Hp - 2, Wp - 2
    tn = o_ref.shape[-1]
    M = NB * H * W

    xp = x_ref[...]                                     # whole padded block (VMEM)
    acc = jnp.broadcast_to(b_ref[...], (M, tn))         # bias-initialised f32 acc
    for dw in range(3):                                 # hoisted W-shift: 3 relayouts, not 9
        cols = xp[:, :, dw:dw + W, :]                   # (NB, H+2, W, Cin)
        for dh in range(3):                             # leading-dim slice: no relayout
            patch = cols[:, dh:dh + H, :, :].reshape(M, cin)
            acc = acc + jnp.dot(patch, w_ref[dh * 3 + dw],
                                preferred_element_type=jnp.float32)
    _epilogue_store(acc, o_ref, pool)


def _matmul_bias_relu_kernel(x_ref, w_ref, b_ref, o_ref, *, pool):
    """Single-matmul conv (im2col already applied): used for the Cin=3 layer (K=27)."""
    NB, H, W, K = x_ref.shape
    tn = o_ref.shape[-1]
    M = NB * H * W
    acc = jnp.broadcast_to(b_ref[...], (M, tn)) + jnp.dot(
        x_ref[...].reshape(M, K), w_ref[...], preferred_element_type=jnp.float32)
    _epilogue_store(acc, o_ref, pool)


def _maxpool2x2_kernel(x_ref, o_ref):
    """Standalone MaxPool2d(2,2) (only when the pre-pool feature is collected)."""
    _, Ho, Wo, C = o_ref.shape
    x = x_ref[0].reshape(Ho, 2, Wo, 2, C)
    o_ref[0] = jnp.maximum(jnp.maximum(x[:, 0, :, 0, :], x[:, 0, :, 1, :]),
                           jnp.maximum(x[:, 1, :, 0, :], x[:, 1, :, 1, :]))


# ------------------------------ layer wrappers ----------------------------- #

def _im2col_3x3(x_nhwc):
    """(N, H, W, C) -> (N, H, W, 9*C); tap order (kh, kw, c) matches weight packing."""
    N, H, W, C = x_nhwc.shape
    xp = jnp.pad(x_nhwc, ((0, 0), (1, 1), (1, 1), (0, 0)))
    cols = [xp[:, dh:dh + H, dw:dw + W, :] for dh in range(3) for dw in range(3)]
    return jnp.concatenate(cols, axis=-1)


def conv3x3_relu(x_nhwc, w, b, *, pool=False):
    """Conv2d(3x3, stride=1, pad=1) + bias + ReLU (+ optional fused 2x2 maxpool)."""
    N, H, W, _ = x_nhwc.shape
    Cout = w.shape[-1]
    tn = min(Cout, 256)                      # Cout tiling (matches 256-wide MXU)
    assert Cout % tn == 0
    if pool:
        assert H % 2 == 0 and W % 2 == 0
    Ho, Wo = (H // 2, W // 2) if pool else (H, W)
    NB = N if H * W <= 256 else 1            # fold batch into matmul M for small maps
    assert N % NB == 0

    if w.ndim == 2:                          # Cin==3 first layer: K = 9*Cin im2col path
        xin = _im2col_3x3(x_nhwc)
        x_block = (NB, H, W, w.shape[0])
        w_block = (w.shape[0], tn)
        kernel = partial(_matmul_bias_relu_kernel, pool=pool)
    else:                                    # general path: 9-tap in-kernel reduction
        xin = jnp.pad(x_nhwc, ((0, 0), (1, 1), (1, 1), (0, 0)))
        x_block = (NB, H + 2, W + 2, w.shape[1])
        w_block = (9, w.shape[1], tn)
        kernel = partial(_conv3x3_taps_kernel, pool=pool)

    n_blocks, j_blocks = N // NB, Cout // tn
    x_bytes = math.prod(x_block) * xin.dtype.itemsize
    w_bytes = math.prod(w_block) * w.dtype.itemsize
    if x_bytes >= w_bytes:
        # x is the bigger resident operand -> vary Cout tiles fastest (x not re-DMA'd)
        grid = (n_blocks, j_blocks)
        xmap = lambda n, j: (n, 0, 0, 0)
        wmap = (lambda n, j: (0, j)) if len(w_block) == 2 else (lambda n, j: (0, 0, j))
        bmap = lambda n, j: (0, j)
        omap = lambda n, j: (n, 0, 0, j)
    else:
        # weights bigger -> vary batch blocks fastest (weight tile stays resident)
        grid = (j_blocks, n_blocks)
        xmap = lambda j, n: (n, 0, 0, 0)
        wmap = (lambda j, n: (0, j)) if len(w_block) == 2 else (lambda j, n: (0, 0, j))
        bmap = lambda j, n: (0, j)
        omap = lambda j, n: (n, 0, 0, j)

    return pl.pallas_call(
        kernel,
        out_shape=jax.ShapeDtypeStruct((N, Ho, Wo, Cout), x_nhwc.dtype),
        grid_spec=pltpu.PrefetchScalarGridSpec(
            num_scalar_prefetch=0,
            grid=grid,
            in_specs=[pl.BlockSpec(x_block, xmap),
                      pl.BlockSpec(w_block, wmap),
                      pl.BlockSpec((1, tn), bmap)],
            out_specs=pl.BlockSpec((NB, Ho, Wo, tn), omap),
        ),
        compiler_params=pltpu.CompilerParams(
            dimension_semantics=("parallel", "parallel"),
            vmem_limit_bytes=_VMEM_LIMIT),
    )(xin, w, b.reshape(1, Cout).astype(jnp.float32))


def maxpool2x2(x_nhwc):
    """Standalone MaxPool2d(2,2) (only needed when the pre-pool map is collected)."""
    N, H, W, C = x_nhwc.shape
    Ho, Wo = H // 2, W // 2
    return pl.pallas_call(
        _maxpool2x2_kernel,
        out_shape=jax.ShapeDtypeStruct((N, Ho, Wo, C), x_nhwc.dtype),
        grid_spec=pltpu.PrefetchScalarGridSpec(
            num_scalar_prefetch=0,
            grid=(N,),
            in_specs=[pl.BlockSpec((1, H, W, C), lambda n: (n, 0, 0, 0))],
            out_specs=pl.BlockSpec((1, Ho, Wo, C), lambda n: (n, 0, 0, 0)),
        ),
        compiler_params=pltpu.CompilerParams(
            dimension_semantics=("parallel",),
            vmem_limit_bytes=_VMEM_LIMIT),
    )(x_nhwc)


# ------------------------- VGG19 features (synthetic) ---------------------- #

def _pack_conv_weight(w_oihw):
    """(Cout, Cin, 3, 3) f32 -> bf16 matmul layout: (27, Cout) if Cin==3 else (9, Cin, Cout)."""
    cout, cin = w_oihw.shape[0], w_oihw.shape[1]
    w_t = jnp.transpose(w_oihw, (2, 3, 1, 0))            # (kh, kw, Cin, Cout)
    if cin == 3:
        return w_t.reshape(9 * cin, cout).astype(jnp.bfloat16)
    return w_t.reshape(9, cin, cout).astype(jnp.bfloat16)


def build_vgg19_params(key):
    """Deterministic synthetic VGG19 'features' params (He-init, not a checkpoint).

    Returns (packed, raw): packed = tuple of (w_packed_bf16, b_f32) per conv layer
    (pre-packed once, no per-forward reshuffle); raw = list of (w_oihw_f32, b_f32)
    kept only for the float32 reference checks.
    """
    packed, raw = [], []
    in_c = 3
    for v in VGG19_CFG:
        if v == 'M':
            continue
        key, kw, kb = jax.random.split(key, 3)
        fan_in = in_c * 9
        w = jax.random.normal(kw, (v, in_c, 3, 3), jnp.float32) * (2.0 / fan_in) ** 0.5
        b = jax.random.normal(kb, (v,), jnp.float32) * 0.01
        raw.append((w, b))
        packed.append((_pack_conv_weight(w), b))
        in_c = v
    assert len(packed) == 16
    return tuple(packed), raw


def _layer_plan():
    plan, p = [], 0
    for v in VGG19_CFG:
        if v == 'M':
            plan.append(('pool', None))
        else:
            plan.append(('conv', p))
            plan.append(('relu', None))
            p += 1
    assert len(plan) == 37
    return plan


def forward_vgg19(x_nchw, style, conv_params):
    """Mirrors ForwardVGG19.forward: NCHW f32 input, list of NCHW f32 feature maps."""
    plan = _layer_plan()
    collect = (3, 8, 15, 22) if style else (15,)
    last = max(collect)                       # early exit: nothing after this is used
    x = jnp.transpose(x_nchw, (0, 2, 3, 1)).astype(jnp.bfloat16)   # NCHW -> NHWC bf16
    results = []
    i = 0
    while i <= last:
        kind, pidx = plan[i]
        if kind == 'conv':
            relu_i = i + 1                    # every vgg19 conv is followed by ReLU
            # fuse the trailing MaxPool only if the ReLU output is not collected
            fuse_pool = (relu_i + 1 <= last and plan[relu_i + 1][0] == 'pool'
                         and relu_i not in collect)
            w, b = conv_params[pidx]
            x = conv3x3_relu(x, w, b, pool=fuse_pool)
            if relu_i in collect:
                results.append(jnp.transpose(x, (0, 3, 1, 2)).astype(jnp.float32))
            i = relu_i + (2 if fuse_pool else 1)
        elif kind == 'pool':
            x = maxpool2x2(x)
            i += 1
        else:                                 # bare ReLU (unreachable for VGG19 cfg)
            x = jnp.maximum(x, 0)
            i += 1
    return results


# ------------------------------ f32 references ------------------------------ #

def _conv_relu_ref(x_nhwc, w_oihw, b):
    y = jax.lax.conv_general_dilated(
        x_nhwc, jnp.transpose(w_oihw, (2, 3, 1, 0)),
        window_strides=(1, 1), padding=((1, 1), (1, 1)),
        dimension_numbers=("NHWC", "HWIO", "NHWC"))
    return jnp.maximum(y + b, 0.0)


def _maxpool_ref(x):
    N, H, W, C = x.shape
    return x.reshape(N, H // 2, 2, W // 2, 2, C).max(axis=(2, 4))


if __name__ == "__main__":
    root = jax.random.PRNGKey(0)
    kx, kp, kc = jax.random.split(root, 3)

    # Small input consistent with the module: NCHW, 3 input channels (VGG).
    x = jax.random.normal(kx, (2, 3, 32, 32), jnp.float32)
    conv_params, raw_params = build_vgg19_params(kp)

    # --- correctness spot-checks vs pure-JAX f32 reference (bf16-rounded inputs) ---
    x_nhwc = jnp.transpose(x, (0, 2, 3, 1)).astype(jnp.bfloat16)

    # (a) first layer: Cin=3, K=27 im2col path, no pool
    w0, b0 = raw_params[0]
    got = conv3x3_relu(x_nhwc, conv_params[0][0], conv_params[0][1], pool=False)
    ref = _conv_relu_ref(x_nhwc.astype(jnp.float32),
                         w0.astype(jnp.bfloat16).astype(jnp.float32), b0)
    np.testing.assert_allclose(np.asarray(got.astype(jnp.float32)), np.asarray(ref),
                               rtol=0.05, atol=0.05)

    # (b) Cin=64 taps path with fused 2x2 maxpool (batch folded: H*W <= 256)
    xb = jax.random.normal(kc, (2, 16, 16, 64), jnp.float32).astype(jnp.bfloat16)
    w1, b1 = raw_params[1]
    got = conv3x3_relu(xb, conv_params[1][0], conv_params[1][1], pool=True)
    ref = _maxpool_ref(_conv_relu_ref(xb.astype(jnp.float32),
                                      w1.astype(jnp.bfloat16).astype(jnp.float32), b1))
    np.testing.assert_allclose(np.asarray(got.astype(jnp.float32)), np.asarray(ref),
                               rtol=0.05, atol=0.05)

    # --- full forward: one jitted program per (static) style flag ---
    fwd = jax.jit(forward_vgg19, static_argnums=1)

    # style=True branch: features after layers 3, 8, 15, 22
    results = jax.block_until_ready(fwd(x, True, conv_params))
    expected = [(2, 64, 32, 32), (2, 128, 16, 16), (2, 256, 8, 8), (2, 512, 4, 4)]
    assert [tuple(r.shape) for r in results] == expected, \
        [tuple(r.shape) for r in results]
    assert all(bool(jnp.isfinite(r).all()) for r in results)

    # style=False branch: single feature after layer 15
    r2 = jax.block_until_ready(fwd(x, False, conv_params))
    assert len(r2) == 1 and tuple(r2[0].shape) == (2, 256, 8, 8)
    assert bool(jnp.isfinite(r2[0]).all())

    print("KERNEL_OK")
</pallas_src>

<mosaic_0001>
module attributes {stable_mosaic.version = 11 : i64} {
  func.func @_matmul_bias_relu_kernel(%arg0: i32, %arg1: i32, %arg2: memref<1x32x32x27xbf16, #tpu.memory_space<vmem>>, %arg3: memref<27x64xbf16, #tpu.memory_space<vmem>>, %arg4: memref<1x64xf32, #tpu.memory_space<vmem>>, %arg5: memref<1x32x32x64xbf16, #tpu.memory_space<vmem>>) attributes {dimension_semantics = [#tpu.dimension_semantics<parallel>, #tpu.dimension_semantics<parallel>], iteration_bounds = array<i64: 2, 1>, scalar_prefetch = 0 : i64, scratch_operands = 0 : i64, tpu.core_type = #tpu.core_type<tc>, window_params = [{transform_indices = @transform_0, window_bounds = array<i64: 1, 32, 32, 27>}, {transform_indices = @transform_1, window_bounds = array<i64: 27, 64>}, {transform_indices = @transform_2, window_bounds = array<i64: 1, 64>}, {transform_indices = @transform_3, window_bounds = array<i64: 1, 32, 32, 64>}]} {
    %c0 = arith.constant 0 : index
    %c0_0 = arith.constant 0 : index
    %0 = vector.load %arg4[%c0, %c0_0] : memref<1x64xf32, #tpu.memory_space<vmem>>, vector<1x64xf32>
    %1 = vector.shape_cast %0 : vector<1x64xf32> to vector<1x64xf32>
    %2 = vector.broadcast %1 : vector<1x64xf32> to vector<1024x64xf32>
    %c0_1 = arith.constant 0 : index
    %c0_2 = arith.constant 0 : index
    %c0_3 = arith.constant 0 : index
    %c0_4 = arith.constant 0 : index
    %3 = vector.load %arg2[%c0_1, %c0_2, %c0_3, %c0_4] : memref<1x32x32x27xbf16, #tpu.memory_space<vmem>>, vector<1x32x32x27xbf16>
    %4 = vector.shape_cast %3 : vector<1x32x32x27xbf16> to vector<1024x27xbf16>
    %c0_5 = arith.constant 0 : index
    %c0_6 = arith.constant 0 : index
    %5 = vector.load %arg3[%c0_5, %c0_6] : memref<27x64xbf16, #tpu.memory_space<vmem>>, vector<27x64xbf16>
    %cst = arith.constant dense<0.000000e+00> : vector<1024x64xf32>
    %6 = tpu.matmul %4, %5, %cst {dimension_numbers = #tpu.dot_dimension_numbers<[1], [0], [0], [1], [0, 0, 1, 1], [], []>} : vector<1024x27xbf16>, vector<27x64xbf16>, vector<1024x64xf32> -> vector<1024x64xf32>
    %7 = arith.addf %2, %6 : vector<1024x64xf32>
    %cst_7 = arith.constant 0.000000e+00 : f32
    %8 = vector.broadcast %cst_7 : f32 to vector<1024x64xf32>
    %9 = arith.maximumf %7, %8 : vector<1024x64xf32>
    %10 = vector.shape_cast %9 : vector<1024x64xf32> to vector<1x32x32x64xf32>
    %11 = arith.truncf %10 : vector<1x32x32x64xf32> to vector<1x32x32x64xbf16>
    %c0_8 = arith.constant 0 : index
    %c0_9 = arith.constant 0 : index
    %c0_10 = arith.constant 0 : index
    %c0_11 = arith.constant 0 : index
    %12 = vector.load %arg5[%c0_8, %c0_9, %c0_10, %c0_11] : memref<1x32x32x64xbf16, #tpu.memory_space<vmem>>, vector<1x32x32x64xbf16>
    tpu.vector_store %arg5[%c0_8, %c0_9, %c0_10, %c0_11], %11 {strides = array<i32>} : memref<1x32x32x64xbf16, #tpu.memory_space<vmem>>, vector<1x32x32x64xbf16>,
    return
  }
  func.func @transform_0(%arg0: i32, %arg1: i32) -> (i32, i32, i32, i32) {
    %c0_i32 = arith.constant 0 : i32
    %c0_i32_0 = arith.constant 0 : i32
    %c0_i32_1 = arith.constant 0 : i32
    %c0_i32_2 = arith.constant 0 : i32
    return %arg0, %c0_i32, %c0_i32_0, %c0_i32_1 : i32, i32, i32, i32
  }
  func.func @transform_1(%arg0: i32, %arg1: i32) -> (i32, i32) {
    %c0_i32 = arith.constant 0 : i32
    %c0_i32_0 = arith.constant 0 : i32
    return %c0_i32, %arg1 : i32, i32
  }
  func.func @transform_2(%arg0: i32, %arg1: i32) -> (i32, i32) {
    %c0_i32 = arith.constant 0 : i32
    %c0_i32_0 = arith.constant 0 : i32
    return %c0_i32, %arg1 : i32, i32
  }
  func.func @transform_3(%arg0: i32, %arg1: i32) -> (i32, i32, i32, i32) {
    %c0_i32 = arith.constant 0 : i32
    %c0_i32_0 = arith.constant 0 : i32
    %c0_i32_1 = arith.constant 0 : i32
    return %arg0, %c0_i32, %c0_i32_0, %arg1 : i32, i32, i32, i32
  }
}

</mosaic_0001>

<bundles_post_ra>
// kernel: tpu_custom_call.1
= control target key start
LH: loop header
LB: loop body
LE: loop exit
PB: predicated region body
PF: predicated region fallthrough
CT: control target
= control target key end

     0   :  { %8 = vsyncpa [#allocation3], 0  ;;  %s4233_s0 = inlined_call_operand.hbm [shape: bf16[2,32,32,27], index: 0, kind: input, shape index: {}]   ;;  %s4234_s1 = inlined_call_operand.hbm [shape: bf16[27,64], index: 1, kind: input, shape index: {}]   ;;  %s4235_s2 = inlined_call_operand.hbm [shape: f32[1,64], index: 2, kind: input, shape index: {}]   ;;  %s4236_s3 = inlined_call_operand.hbm [shape: bf16[2,32,32,64], index: 3, kind: output, shape index: {}]  }
   0x1   :  { %10 = vsyncpa [#allocation3 + $0x1], 0 }
   0x2   :  { %11 = vsyncpa [#allocation6], 0 }
   0x3   :  { %12 = vsyncpa [#allocation4], 0 }
   0x4   :  { %14 = vsyncpa [#allocation4 + $0x1], 0  ;;  %s3446_s12 = smov 0   ;;  %s3448_s13 = smov 0  }
   0x5   :  { %s3450_s14 = smov 0   ;;  %s3452_s15 = smov 0  }
   0x6   :  { %s3454_s16 = smov 0   ;;  %s3456_s17 = smov 0  }
   0x7 LB: > { %s2478_s18 = sadd.s32 4294967295, %s3415_s17   ;;  %s2479_s19 = sadd.s32 4294967294, %s3415_s17   ;;  %s3415_s17 = sphi %s3456_s17, %s20_s17   ;;  %s3411_s16 = sphi %s3454_s16, %s4258_s16   ;;  %s3407_s15 = sphi %s3452_s15, %s4257_s15   ;;  %s3403_s14 = sphi %s3450_s14, %s4256_s14   ;;  %s3399_s13 = sphi %s3448_s13, %s4255_s13   ;;  %s3395_s12 = sphi %s3446_s12, %s4254_s12  }
   0x8   : > { %p52_p0 = scmp.ne.s32.totalorder %s3399_s13, %s3395_s12  ;;  %p3480_p1 = scmp.eq.s32.totalorder %s2478_s18, 0 }
   0x9   : > { %p3484_p2 = scmp.eq.s32.totalorder %s2478_s18, 1  ;;  %p136_p3 = scmp.eq.s32.totalorder %s2479_s19, 1 }
   0xa   : > { %s4241_s20 = scalar_select %p3480_p1, 1, 0 }
   0xb   : > { %p3490_p4 = por %p3480_p1, %p52_p0  ;;  %p2480_p5 = scmp.ge.s32.totalorder %s3415_s17, 1 }
   0xc   : > { %p3495_p6 = por %p136_p3, %p52_p0  ;;  %p143_p7 = scmp.lt.s32.totalorder %s3415_s17, 3 }
   0xd   : > { %s4243_s22 = scalar_select %p3490_p4, 1, 0 }
   0xe   : > { %s4244_s23 = scalar_select %p3495_p6, 1, 0 }
   0xf   : > { %p3500_p8 = pnand %p2480_p5, %p143_p7  ;;  %s3417_s25 = smov [#allocation5]  }
  0x10   : > { %s157_s26 = sshll.u32 %s3417_s25, 4  ;;  %s3418_s28 = smov [#allocation7]   ;;  %s3504_s26 = int_to_ptr.vmem [resolvable:$true] %s157_s26 }
  0x11   : > { %p3100_p9 = pneg %p3500_p8  ;;  %s173_s29 = sshll.u32 %s3418_s28, 4  ;;  %s3515_s29 = int_to_ptr.vmem [resolvable:$true] %s173_s29 }
  0x12   : > { %s3243_s5 = scalar_lea.hbm %s4234_s1, 256 }
  0x13   : > { %p3511_p11 = pnand %p3100_p9, %p3480_p1  ;;  %p3244_p12 = scmp.ne.s32.totalorder %s4234_s1, %s3243_s5 }
  0x14   : > { %p3250_p5 = scmp.lt.u32.totalorder %s3243_s5, %s4234_s1 }
  0x15   : > { %p3245_p13 = pneg %p3511_p11 }
  0x17   : > { %p3246_p0 = pnand %p3245_p13, %p3244_p12 }
  0x19   : > { %p3247_p3 = pneg %p3246_p0 }
  0x1b   : > { %p3252_p7 = pnand %p3250_p5, %p3247_p3 }
  0x1d   : > { %3255 = shalt.err (!%p3252_p7)
}
  0x1e   : > { %s3256_s10 = scalar_lea.vmem %s3504_s26, 256  ;;  %p3264_p1 = scmp.lt.s32.totalorder %s3504_s26, %s3504_s26 }
  0x1f   : > { %p3257_p9 = scmp.ne.s32.totalorder %s3504_s26, %s3256_s10  ;;  %p3265_p12 = scmp.lt.s32.totalorder %s3256_s10, %s3256_s10 }
  0x21   : > { %p3259_p10 = pnand %p3257_p9, %p3245_p13  ;;  %p3266_p0 = por %p3265_p12, %p3264_p1 }
  0x23   : > { %p3260_p6 = pneg %p3259_p10 }
  0x25   : > { %p3267_p4 = pnand %p3266_p0, %p3260_p6 }
  0x27   : > { %3270 = shalt.err (!%p3267_p4)
}
  0x28   : > { %s3419_s11 = smov 64   ;;  %s3420_s18 = smov 4  }
  0x29   : > { %3103 = dma.hbm_to_vmem [thread:$0]  (!%p3511_p11), %s4234_s1, 256, %s3504_s26, [#allocation6], %s3419_s11, %s3419_s11, %s3420_s18  }
  0x2a   : > { %s3271_s4 = scalar_lea.hbm %s4235_s2, 16 }
  0x2b   : > { %p3272_p1 = scmp.ne.s32.totalorder %s4235_s2, %s3271_s4  ;;  %p3278_p10 = scmp.lt.u32.totalorder %s3271_s4, %s4235_s2 }
  0x2d   : > { %p3274_p4 = pnand %p3272_p1, %p3245_p13 }
  0x2f   : > { %p3275_p6 = pneg %p3274_p4 }
  0x31   : > { %p3280_p3 = pnand %p3278_p10, %p3275_p6 }
  0x33   : > { %3283 = shalt.err (!%p3280_p3)
}
  0x34   : > { %s3284_s26 = scalar_lea.vmem %s3515_s29, 16  ;;  %s3291_s9 = scalar_lea.vmem %s3515_s29, 32 }
  0x35   : > { %p3285_p5 = scmp.ne.s32.totalorder %s3515_s29, %s3284_s26  ;;  %p3292_p12 = scmp.lt.s32.totalorder %s3515_s29, %s3515_s29 }
  0x36   : > { %p3293_p0 = scmp.lt.s32.totalorder %s3291_s9, %s3284_s26 }
  0x37   : > { %p3287_p7 = pnand %p3285_p5, %p3245_p13 }
  0x38   : > { %p3294_p1 = por %p3293_p0, %p3292_p12 }
  0x39   : > { %p3288_p9 = pneg %p3287_p7 }
  0x3b   : > { %p3295_p4 = pnand %p3294_p1, %p3288_p9 }
  0x3d   : > { %3298 = shalt.err (!%p3295_p4)
}
  0x3e   : > { %3106 = dma.hbm_to_vmem [thread:$0]  (!%p3511_p11), %s4235_s2, 16, %s3515_s29, [#allocation6]  }
  0x3f   : > { %s32_s25 = sadd.s32 1, %s3411_s16  ;;  %s39_s28 = sadd.s32 1, %s3403_s14 }
  0x40   : > { %p34_p13 = scmp.ge.s32.totalorder %s32_s25, 2  ;;  %p46_p6 = scmp.ne.s32.totalorder %s3403_s14, %s3399_s13 }
  0x41   : > { %p47_p10 = scmp.eq.s32.totalorder %s3415_s17, 0  ;;  %p3117_p3 = scmp.lt.s32.totalorder %s3415_s17, 2 }
  0x42   : > { %s4260_s25 = smov (%p34_p13, %s32_s25), 0  ;;  %p3583_p7 = por %p3484_p2, %p46_p6 }
  0x43   : > { %p48_p5 = por %p47_p10, %p46_p6  ;;  %s36_s30 = ssub.s32 %s3411_s16, %s4260_s25 }
  0x44   : > { %s4247_s27 = scalar_select %p3583_p7, 1, 0 }
  0x45   : > { %s184_s4 = sand.u32 1, %s3403_s14   ;;  %p37_p9 = scmp.eq.s32.totalorder %s36_s30, 0 }
  0x46   : > { %s2484_s29 = sshll.u32 %s184_s4, 9  ;;  %s2756_s5 = sshll.u32 %s3411_s16, 13 }
  0x47   : > { %s3592_s6 = scalar_select %p37_p9, %s3403_s14, %s39_s28  }
  0x48   : > { %s3597_s26 = scalar_lea.hbm %s4233_s0, %s2756_s5  ;;  %s188_s21 = scalar_lea.vmem [#allocation2], %s2484_s29 }
  0x49   : > { %s195_s9 = sshll.u32 %s188_s21, 4  ;;  %p3601_p2 = pnand %p3117_p3, %p48_p5  ;;  %s3605_s9 = int_to_ptr.vmem [resolvable:$true] %s195_s9 }
  0x4a   : > { %s3607_s19 = scalar_lea.sflag [#allocation3], %s184_s4  ;;  %s3299_s28 = scalar_lea.hbm %s3597_s26, 8192 }
  0x4b   : > { %p3300_p11 = scmp.ne.s32.totalorder %s3597_s26, %s3299_s28  ;;  %p3301_p12 = pneg %p3601_p2 }
  0x4c   : > { %s3304_s5 = scalar_lea.hbm %s4233_s0, 16384  ;;  %p3305_p4 = scmp.lt.u32.totalorder %s3597_s26, %s4233_s0 }
  0x4d   : > { %p3302_p0 = pnand %p3301_p12, %p3300_p11  ;;  %p3306_p13 = scmp.lt.u32.totalorder %s3304_s5, %s3299_s28 }
  0x4e   : > { %p3308_p10 = scmp.lt.u32.totalorder %s3299_s28, %s3597_s26 }
  0x4f   : > { %p3303_p1 = pneg %p3302_p0  ;;  %p3307_p6 = por %p3306_p13, %p3305_p4 }
  0x51   : > { %p3309_p3 = por %p3308_p10, %p3307_p6 }
  0x53   : > { %p3310_p5 = pnand %p3309_p3, %p3303_p1 }
  0x55   : > { %3313 = shalt.err (!%p3310_p5)
}
  0x56   : > { %s3314_s4 = scalar_lea.vmem %s3605_s9, 8192  ;;  %s3421_s21 = smov [#allocation2]  }
  0x57   : > { %p3315_p9 = scmp.ne.s32.totalorder %s3605_s9, %s3314_s4  ;;  %s3319_s30 = sshll.u32 %s3421_s21, 4  ;;  %s3320_s30 = int_to_ptr.vmem [resolvable:$false] %s3319_s30 }
  0x58   : > { %s3321_s29 = scalar_lea.vmem %s3320_s30, 16384  ;;  %p3322_p7 = scmp.lt.s32.totalorder %s3605_s9, %s3320_s30 }
  0x59   : > { %p3317_p11 = pnand %p3315_p9, %p3301_p12  ;;  %p3323_p4 = scmp.lt.s32.totalorder %s3321_s29, %s3314_s4 }
  0x5b   : > { %p3318_p0 = pneg %p3317_p11  ;;  %p3324_p13 = por %p3323_p4, %p3322_p7 }
  0x5d   : > { %p3325_p6 = pnand %p3324_p13, %p3318_p0 }
  0x5f   : > { %3328 = shalt.err (!%p3325_p6)
}
  0x60   : > { %3110 = dma.hbm_to_vmem [thread:$0]  (!%p3601_p2), %s3597_s26, 8192, %s3605_s9, %s3607_s19, %s3419_s11, %s3419_s11, %s3420_s18  }
  0x61   : > { %207 = sbr.rel (%p3500_p8) target bundleno = 474 (0x1da), region = 32  ;;  %s3641_s28 = sand.u32 (!%p3500_p8), 1, %s3399_s13  }
  0x62   : > { %s2488_s5 = sshll.u32 (!%p3500_p8), %s3641_s28, 9  ;;  %s210_s7 = scalar_lea.sflag (!%p3500_p8), [#allocation3], %s3641_s28 }
  0x63   : > { %s3647_s10 = scalar_lea.vmem (!%p3500_p8), [#allocation2], %s2488_s5  ;;  %p4249_p7 = scmp.ne.s32.totalorder (!%p3500_p8), %s4243_s22, 0 }
  0x68   : > { %3382 = dma.done.wait (%p4249_p7), %s210_s7, 8192  }
  0x69   : > { %3384 = vsyncadd (%p4249_p7), %s210_s7, 4294959104  ;;  %p4250_p2 = scmp.ne.s32.totalorder %s4241_s20, 0 }
  0x6b   : > { %3386 = dma.done.wait (%p4250_p2), [#allocation6], 272  }
  0x6c   : > { %3388 = vsyncadd (%p4250_p2), [#allocation6], 4294967024  ;;  %vm908_vm0 = vcmask 1044480   ;;  %vm909_vm1 = vcmask 1045504   ;;  %v3422_v0 = vmov 65535   ;;  %vm715_vm2 = vcmask 220160  }
  0x6d   : > { %v910_v1 = vsel %vm908_vm0, 4294967295, %v3422_v0  ;;  %v3176_v2 = vld [vmem:[#allocation5] sm:$0xff]   ;;  %v3177_v4 = vld [vmem:[#allocation5 + $0x8] sm:$0x3f]   ;;  %v3182_v10 = vld [vmem:[%s3647_s10 + $0x10] sm:$0xff]   ;;  %vm2228_vm3 = vcmask 519168  }
  0x6e   : > { %v911_v3 = vsel %vm909_vm1, %v910_v1, 0  ;;  %2952 = vmatprep.subr.bf16.mxu0 %v3176_v2  ;;  %3084 = vmatprep.subr.bf16.mxu1 %v3176_v2  ;;  %v3178_v5 = vld [vmem:[%s3647_s10] sm:$0xff]   ;;  %v3180_v8 = vld [vmem:[%s3647_s10 + $0x8] sm:$0xff]   ;;  %v3183_v11 = vld [vmem:[%s3647_s10 + $0x110] sm:$0xff]   ;;  %s3797_s20 = scalar_lea.vmem [#allocation8], %s2488_s5  ;;  %s2885_s22 = sshll.u32 %s3407_s15, 13 }
  0x6f   : > { %2953 = vmatpush3.bf16.msra.mxu0 %v3176_v2  ;;  %3086 = vmatpush3.bf16.msra.mxu1 %v3176_v2  ;;  %v913_v6 = vand.u32 %v3177_v4, %v911_v3  ;;  %v3179_v7 = vld [vmem:[%s3647_s10 + $0x100] sm:$0xff]   ;;  %v3181_v9 = vld [vmem:[%s3647_s10 + $0x108] sm:$0xff]   ;;  %v3184_v12 = vld [vmem:[%s3647_s10 + $0x18] sm:$0xff]   ;;  %s2372_s24 = sshll.u32 %s3797_s20, 4  ;;  %s4170_s18 = scalar_lea.hbm %s4236_s3, %s2885_s22  ;;  %s4172_s24 = int_to_ptr.vmem [resolvable:$true] %s2372_s24 }
  0x70   : > { %2956 = vmatprep.mubr.msk.bf16.mxu0 %vm715_vm2, %v3178_v5  ;;  %3020 = vmatprep.mubr.msk.bf16.mxu1 %vm715_vm2, %v3179_v7  ;;  %v3185_v13 = vld [vmem:[%s3647_s10 + $0x118] sm:$0xff]   ;;  %v3186_v14 = vld [vmem:[%s3647_s10 + $0x20] sm:$0xff]   ;;  %v3188_v16 = vld [vmem:[%s3647_s10 + $0x28] sm:$0xff]   ;;  %s2358_s26 = scalar_lea.sflag [#allocation4], %s3641_s28  ;;  %s3329_s9 = scalar_lea.vmem %s4172_s24, 8192 }
  0x71   : > { %2954 = vmatprep.subr.bf16.mxu0 %v913_v6  ;;  %3085 = vmatprep.subr.bf16.mxu1 %v913_v6  ;;  %v3187_v15 = vld [vmem:[%s3647_s10 + $0x120] sm:$0xff]   ;;  %v3189_v17 = vld [vmem:[%s3647_s10 + $0x128] sm:$0xff]   ;;  %v3190_v18 = vld [vmem:[%s3647_s10 + $0x30] sm:$0xff]   ;;  %p3330_p8 = scmp.ne.s32.totalorder %s4172_s24, %s3329_s9  ;;  %p4251_p12 = scmp.ne.s32.totalorder %s4247_s27, 0 }
  0x72   : > { %v3191_v19 = vld [vmem:[%s3647_s10 + $0x130] sm:$0xff]   ;;  %v3192_v20 = vld [vmem:[%s3647_s10 + $0x38] sm:$0xff]   ;;  %v3194_v22 = vld [vmem:[%s3647_s10 + $0x40] sm:$0xff]   ;;  %s3423_s19 = smov [#allocation8]  }
  0x73   : > { %2955 = vmatpush3.bf16.msra.mxu0 %v913_v6  ;;  %3087 = vmatpush3.bf16.msra.mxu1 %v913_v6  ;;  %v3193_v21 = vld [vmem:[%s3647_s10 + $0x138] sm:$0xff]   ;;  %v3195_v23 = vld [vmem:[%s3647_s10 + $0x140] sm:$0xff]   ;;  %v3196_v24 = vld [vmem:[%s3647_s10 + $0x48] sm:$0xff]   ;;  %p3331_p1 = pnand %p3330_p8, %p4251_p12  ;;  %s3333_s8 = sshll.u32 %s3423_s19, 4  ;;  %s3334_s8 = int_to_ptr.vmem [resolvable:$false] %s3333_s8 }
  0x74   : > { %v3197_v25 = vld [vmem:[%s3647_s10 + $0x148] sm:$0xff]   ;;  %v3198_v26 = vld [vmem:[%s3647_s10 + $0x50] sm:$0xff]   ;;  %v3200_v28 = vld [vmem:[%s3647_s10 + $0x58] sm:$0xff]   ;;  %s3335_s4 = scalar_lea.vmem %s3334_s8, 16384  ;;  %p3336_p3 = scmp.lt.s32.totalorder %s4172_s24, %s3334_s8 }
  0x75   : > { %v3199_v27 = vld [vmem:[%s3647_s10 + $0x150] sm:$0xff]   ;;  %v3201_v29 = vld [vmem:[%s3647_s10 + $0x158] sm:$0xff]   ;;  %v3202_v30 = vld [vmem:[%s3647_s10 + $0x60] sm:$0xff]   ;;  %p3332_p10 = pneg %p3331_p1  ;;  %p3337_p5 = scmp.lt.s32.totalorder %s3335_s4, %s3329_s9 }
  0x76   : > { %2957 = vmatmul.mubr.msk.bf16.vlgmr.msra.gmra.mrb[0].mxu0 %vm715_vm2, %v3180_v8  ;;  %3021 = vmatmul.mubr.msk.bf16.vlgmr.msra.gmra.mrb[0].mxu1 %vm715_vm2, %v3181_v9  ;;  %v3203_v31 = vld [vmem:[%s3647_s10 + $0x160] sm:$0xff]   ;;  %v3204_v32 = vld [vmem:[%s3647_s10 + $0x68] sm:$0xff]   ;;  %v3206_v34 = vld [vmem:[%s3647_s10 + $0x70] sm:$0xff]  }
  0x77   : > { %2960 = vmatprep.mubr.msk.bf16.mxu0 %vm715_vm2, %v3182_v10  ;;  %3024 = vmatprep.mubr.msk.bf16.mxu1 %vm715_vm2, %v3183_v11  ;;  %v3205_v33 = vld [vmem:[%s3647_s10 + $0x168] sm:$0xff]   ;;  %v3207_v35 = vld [vmem:[%s3647_s10 + $0x170] sm:$0xff]   ;;  %v3208_v36 = vld [vmem:[%s3647_s10 + $0x78] sm:$0xff]   ;;  %p3338_p9 = por %p3337_p5, %p3336_p3 }
  0x78   : > { %v3209_v37 = vld [vmem:[%s3647_s10 + $0x178] sm:$0xff]   ;;  %v3210_v38 = vld [vmem:[%s3647_s10 + $0x80] sm:$0xff]   ;;  %v3212_v40 = vld [vmem:[%s3647_s10 + $0x88] sm:$0xff]  }
  0x79   : > { %v3211_v39 = vld [vmem:[%s3647_s10 + $0x180] sm:$0xff]   ;;  %v3213_v41 = vld [vmem:[%s3647_s10 + $0x188] sm:$0xff]   ;;  %v3214_v42 = vld [vmem:[%s3647_s10 + $0x90] sm:$0xff]   ;;  %p3339_p11 = pnand %p3338_p9, %p3332_p10 }
  0x7a   : > { %v3215_v43 = vld [vmem:[%s3647_s10 + $0x190] sm:$0xff]   ;;  %v3216_v44 = vld [vmem:[%s3647_s10 + $0x98] sm:$0xff]   ;;  %v3218_v46 = vld [vmem:[%s3647_s10 + $0xa0] sm:$0xff]  }
  0x7b   : > { %v3217_v45 = vld [vmem:[%s3647_s10 + $0x198] sm:$0xff]   ;;  %v3219_v47 = vld [vmem:[%s3647_s10 + $0x1a0] sm:$0xff]   ;;  %v3220_v48 = vld [vmem:[%s3647_s10 + $0xa8] sm:$0xff]  }
  0x7c   : > { %v3221_v49 = vld [vmem:[%s3647_s10 + $0x1a8] sm:$0xff]   ;;  %v3222_v50 = vld [vmem:[%s3647_s10 + $0xb0] sm:$0xff]   ;;  %v3224_v52 = vld [vmem:[%s3647_s10 + $0xb8] sm:$0xff]  }
  0x7d   : > { %v3223_v51 = vld [vmem:[%s3647_s10 + $0x1b0] sm:$0xff]   ;;  %v3225_v53 = vld [vmem:[%s3647_s10 + $0x1b8] sm:$0xff]   ;;  %v3226_v54 = vld [vmem:[%s3647_s10 + $0xc0] sm:$0xff]  }
  0x7e   : > { %2961 = vmatmul.mubr.msk.bf16.gmra.mrb[4].mxu0 %vm715_vm2, %v3184_v12  ;;  %3025 = vmatmul.mubr.msk.bf16.gmra.mrb[4].mxu1 %vm715_vm2, %v3185_v13  ;;  %v3227_v55 = vld [vmem:[%s3647_s10 + $0x1c0] sm:$0xff]   ;;  %v3228_v56 = vld [vmem:[%s3647_s10 + $0xc8] sm:$0xff]   ;;  %v3230_v58 = vld [vmem:[%s3647_s10 + $0xd0] sm:$0xff]  }
  0x7f   : > { %2964 = vmatprep.mubr.msk.bf16.mxu0 %vm715_vm2, %v3186_v14  ;;  %3028 = vmatprep.mubr.msk.bf16.mxu1 %vm715_vm2, %v3187_v15  ;;  %v3229_v57 = vld [vmem:[%s3647_s10 + $0x1c8] sm:$0xff]   ;;  %v3231_v59 = vld [vmem:[%s3647_s10 + $0x1d0] sm:$0xff]   ;;  %v3232_v60 = vld [vmem:[%s3647_s10 + $0xd8] sm:$0xff]  }
  0x80   : > { %v3233_v61 = vld [vmem:[%s3647_s10 + $0x1d8] sm:$0xff]   ;;  %v3234_v62 = vld [vmem:[%s3647_s10 + $0xe0] sm:$0xff]   ;;  %v3236_v0 = vld [vmem:[%s3647_s10 + $0xe8] sm:$0xff]  }
  0x81   : > { %v3235_v63 = vld [vmem:[%s3647_s10 + $0x1e0] sm:$0xff]   ;;  %v3237_v1 = vld [vmem:[%s3647_s10 + $0x1e8] sm:$0xff]   ;;  %v3238_v2 = vld [vmem:[%s3647_s10 + $0xf0] sm:$0xff]  }
  0x82   : > { %v3239_v3 = vld [vmem:[%s3647_s10 + $0x1f0] sm:$0xff]   ;;  %v3240_v4 = vld [vmem:[%s3647_s10 + $0xf8] sm:$0xff]  }
  0x83   : > { %v3241_v5 = vld [vmem:[%s3647_s10 + $0x1f8] sm:$0xff]   ;;  %v3785_v6 = vld [vmem:[#allocation7] ss:$0 sm:$0xff] }
  0x86   : > { %2965 = vmatmul.mubr.msk.bf16.gmra.mrb[8].mxu0 %vm715_vm2, %v3188_v16  ;;  %3029 = vmatmul.mubr.msk.bf16.gmra.mrb[8].mxu1 %vm715_vm2, %v3189_v17 }
  0x87   : > { %2968 = vmatprep.mubr.msk.bf16.mxu0 %vm715_vm2, %v3190_v18  ;;  %3032 = vmatprep.mubr.msk.bf16.mxu1 %vm715_vm2, %v3191_v19 }
  0x8e   : > { %2969 = vmatmul.mubr.msk.bf16.gmra.mrb[12].mxu0 %vm715_vm2, %v3192_v20  ;;  %3033 = vmatmul.mubr.msk.bf16.gmra.mrb[12].mxu1 %vm715_vm2, %v3193_v21 }
  0x8f   : > { %2972 = vmatprep.mubr.msk.bf16.mxu0 %vm715_vm2, %v3194_v22  ;;  %3036 = vmatprep.mubr.msk.bf16.mxu1 %vm715_vm2, %v3195_v23 }
  0x96   : > { %2973 = vmatmul.mubr.msk.bf16.gmra.mrb[16].mxu0 %vm715_vm2, %v3196_v24  ;;  %3037 = vmatmul.mubr.msk.bf16.gmra.mrb[16].mxu1 %vm715_vm2, %v3197_v25 }
  0x97   : > { %2976 = vmatprep.mubr.msk.bf16.mxu0 %vm715_vm2, %v3198_v26  ;;  %3040 = vmatprep.mubr.msk.bf16.mxu1 %vm715_vm2, %v3199_v27 }
  0x9e   : > { %2977 = vmatmul.mubr.msk.bf16.gmra.mrb[20].mxu0 %vm715_vm2, %v3200_v28  ;;  %3041 = vmatmul.mubr.msk.bf16.gmra.mrb[20].mxu1 %vm715_vm2, %v3201_v29 }
  0x9f   : > { %2980 = vmatprep.mubr.msk.bf16.mxu0 %vm715_vm2, %v3202_v30  ;;  %3044 = vmatprep.mubr.msk.bf16.mxu1 %vm715_vm2, %v3203_v31 }
  0xa6   : > { %2981 = vmatmul.mubr.msk.bf16.gmra.mrb[24].mxu0 %vm715_vm2, %v3204_v32  ;;  %3045 = vmatmul.mubr.msk.bf16.gmra.mrb[24].mxu1 %vm715_vm2, %v3205_v33 }
  0xa7   : > { %2984 = vmatprep.mubr.msk.bf16.mxu0 %vm715_vm2, %v3206_v34  ;;  %3048 = vmatprep.mubr.msk.bf16.mxu1 %vm715_vm2, %v3207_v35 }
  0xae   : > { %2985 = vmatmul.mubr.msk.bf16.gmra.mrb[28].mxu0 %vm715_vm2, %v3208_v36  ;;  %3049 = vmatmul.mubr.msk.bf16.gmra.mrb[28].mxu1 %vm715_vm2, %v3209_v37 }
  0xaf   : > { %2988 = vmatprep.mubr.msk.bf16.mxu0 %vm715_vm2, %v3210_v38  ;;  %3052 = vmatprep.mubr.msk.bf16.mxu1 %vm715_vm2, %v3211_v39 }
  0xb6   : > { %2989 = vmatmul.mubr.msk.bf16.gmra.mrb[32].mxu0 %vm715_vm2, %v3212_v40  ;;  %3053 = vmatmul.mubr.msk.bf16.gmra.mrb[32].mxu1 %vm715_vm2, %v3213_v41 }
  0xb7   : > { %2992 = vmatprep.mubr.msk.bf16.mxu0 %vm715_vm2, %v3214_v42  ;;  %3056 = vmatprep.mubr.msk.bf16.mxu1 %vm715_vm2, %v3215_v43 }
  0xbe   : > { %2993 = vmatmul.mubr.msk.bf16.gmra.mrb[36].mxu0 %vm715_vm2, %v3216_v44  ;;  %3057 = vmatmul.mubr.msk.bf16.gmra.mrb[36].mxu1 %vm715_vm2, %v3217_v45 }
  0xbf   : > { %2996 = vmatprep.mubr.msk.bf16.mxu0 %vm715_vm2, %v3218_v46  ;;  %3060 = vmatprep.mubr.msk.bf16.mxu1 %vm715_vm2, %v3219_v47 }
  0xc6   : > { %2997 = vmatmul.mubr.msk.bf16.gmra.mrb[40].mxu0 %vm715_vm2, %v3220_v48  ;;  %3061 = vmatmul.mubr.msk.bf16.gmra.mrb[40].mxu1 %vm715_vm2, %v3221_v49 }
  0xc7   : > { %3000 = vmatprep.mubr.msk.bf16.mxu0 %vm715_vm2, %v3222_v50  ;;  %3064 = vmatprep.mubr.msk.bf16.mxu1 %vm715_vm2, %v3223_v51 }
  0xce   : > { %3001 = vmatmul.mubr.msk.bf16.gmra.mrb[44].mxu0 %vm715_vm2, %v3224_v52  ;;  %3065 = vmatmul.mubr.msk.bf16.gmra.mrb[44].mxu1 %vm715_vm2, %v3225_v53 }
  0xcf   : > { %3004 = vmatprep.mubr.msk.bf16.mxu0 %vm715_vm2, %v3226_v54  ;;  %3068 = vmatprep.mubr.msk.bf16.mxu1 %vm715_vm2, %v3227_v55 }
  0xd6   : > { %3005 = vmatmul.mubr.msk.bf16.gmra.mrb[48].mxu0 %vm715_vm2, %v3228_v56  ;;  %3069 = vmatmul.mubr.msk.bf16.gmra.mrb[48].mxu1 %vm715_vm2, %v3229_v57 }
  0xd7   : > { %3008 = vmatprep.mubr.msk.bf16.mxu0 %vm715_vm2, %v3230_v58  ;;  %3072 = vmatprep.mubr.msk.bf16.mxu1 %vm715_vm2, %v3231_v59 }
  0xde   : > { %3009 = vmatmul.mubr.msk.bf16.gmra.mrb[52].mxu0 %vm715_vm2, %v3232_v60  ;;  %3073 = vmatmul.mubr.msk.bf16.gmra.mrb[52].mxu1 %vm715_vm2, %v3233_v61 }
  0xdf   : > { %3012 = vmatprep.mubr.msk.bf16.mxu0 %vm715_vm2, %v3234_v62  ;;  %3076 = vmatprep.mubr.msk.bf16.mxu1 %vm715_vm2, %v3235_v63 }
  0xe6   : > { %3013 = vmatmul.mubr.msk.bf16.gmra.mrb[56].mxu0 %vm715_vm2, %v3236_v0  ;;  %3077 = vmatmul.mubr.msk.bf16.gmra.mrb[56].mxu1 %vm715_vm2, %v3237_v1 }
  0xe7   : > { %3016 = vmatprep.mubr.msk.bf16.mxu0 %vm715_vm2, %v3238_v2  ;;  %3080 = vmatprep.mubr.msk.bf16.mxu1 %vm715_vm2, %v3239_v3 }
  0xee   : > { %3017 = vmatmul.mubr.msk.bf16.gmra.mrb[60].mxu0 %vm715_vm2, %v3240_v4  ;;  %3081 = vmatmul.mubr.msk.bf16.gmra.mrb[60].mxu1 %vm715_vm2, %v3241_v5 }
 0x149   : > { %v2958_v7 = vpop.f32.mrb[0].mxu0  ;;  %v3022_v8 = vpop.f32.mrb[0].mxu1 }
 0x14a   : > { %v1462_v9 = vadd.f32 %v2958_v7, %v3785_v6  ;;  %v1526_v10 = vadd.f32 %v3022_v8, %v3785_v6  ;;  %v949_v11 = vpop.f32.mrb[1].mxu0  ;;  %v1205_v12 = vpop.f32.mrb[1].mxu1 }
 0x14b   : > { %v1460_v13 = vadd.f32 %v3785_v6, %v949_v11  ;;  %v1524_v14 = vadd.f32 %v3785_v6, %v1205_v12  ;;  %v2959_v15 = vpop.f32.mrb[2].mxu0  ;;  %v3023_v16 = vpop.f32.mrb[2].mxu1 }
 0x14c   : > { %v1590_v17 = vmax.f32 %v1462_v9, 0.0  ;;  %v1654_v18 = vmax.f32 %v1526_v10, 0.0  ;;  %v1463_v19 = vadd.f32 %v2959_v15, %v3785_v6  ;;  %v1527_v20 = vadd.f32 %v3023_v16, %v3785_v6  ;;  %v952_v21 = vpop.f32.mrb[3].mxu0  ;;  %v1208_v22 = vpop.f32.mrb[3].mxu1 }
 0x14d   : > { %v1588_v23 = vmax.f32 %v1460_v13, 0.0  ;;  %v1652_v24 = vmax.f32 %v1524_v14, 0.0  ;;  %v1461_v25 = vadd.f32 %v3785_v6, %v952_v21  ;;  %v1525_v26 = vadd.f32 %v3785_v6, %v1208_v22 }
 0x14e   : > { %v2759_v27 = vpack.c.bf16 %v1590_v17, %v1590_v17  ;;  %v2823_v28 = vpack.c.bf16 %v1654_v18, %v1654_v18  ;;  %v1591_v29 = vmax.f32 %v1463_v19, 0.0  ;;  %v1655_v30 = vmax.f32 %v1527_v20, 0.0 }
 0x14f   : > { %v2757_v31 = vpack.c.bf16 %v1588_v23, %v1588_v23  ;;  %v2821_v32 = vpack.c.bf16 %v1652_v24, %v1652_v24  ;;  %v1589_v33 = vmax.f32 %v1461_v25, 0.0  ;;  %v1653_v34 = vmax.f32 %v1525_v26, 0.0 }
 0x150   : > { %2231 = vst.msk [vmem:[%s3797_s20 + $0x8] sm:$0xf] %vm2228_vm3, %v2759_v27  ;;  %2295 = vst.msk [vmem:[%s3797_s20 + $0x108] sm:$0xf] %vm2228_vm3, %v2823_v28  ;;  %v2760_v35 = vpack.c.bf16 %v1591_v29, %v1591_v29  ;;  %v2824_v36 = vpack.c.bf16 %v1655_v30, %v1655_v30 }
 0x151   : > { %2229 = vst.msk [vmem:[%s3797_s20] sm:$0xf] %vm2228_vm3, %v2757_v31  ;;  %2293 = vst.msk [vmem:[%s3797_s20 + $0x100] sm:$0xf] %vm2228_vm3, %v2821_v32  ;;  %v2758_v37 = vpack.c.bf16 %v1589_v33, %v1589_v33  ;;  %v2822_v38 = vpack.c.bf16 %v1653_v34, %v1653_v34  ;;  %v2962_v39 = vpop.f32.mrb[4].mxu0  ;;  %v3026_v40 = vpop.f32.mrb[4].mxu1 }
 0x152   : > { %2232 = vst.msk [vmem:[%s3797_s20 + $0xc] sm:$0xf] %vm2228_vm3, %v2760_v35  ;;  %2296 = vst.msk [vmem:[%s3797_s20 + $0x10c] sm:$0xf] %vm2228_vm3, %v2824_v36  ;;  %v1466_v41 = vadd.f32 %v2962_v39, %v3785_v6  ;;  %v1530_v42 = vadd.f32 %v3026_v40, %v3785_v6  ;;  %v965_v43 = vpop.f32.mrb[5].mxu0  ;;  %v1221_v44 = vpop.f32.mrb[5].mxu1 }
 0x153   : > { %2230 = vst.msk [vmem:[%s3797_s20 + $0x4] sm:$0xf] %vm2228_vm3, %v2758_v37  ;;  %2294 = vst.msk [vmem:[%s3797_s20 + $0x104] sm:$0xf] %vm2228_vm3, %v2822_v38  ;;  %v1464_v45 = vadd.f32 %v3785_v6, %v965_v43  ;;  %v1528_v46 = vadd.f32 %v3785_v6, %v1221_v44  ;;  %v2963_v47 = vpop.f32.mrb[6].mxu0  ;;  %v3027_v48 = vpop.f32.mrb[6].mxu1 }
 0x154   : > { %v1594_v49 = vmax.f32 %v1466_v41, 0.0  ;;  %v1658_v50 = vmax.f32 %v1530_v42, 0.0  ;;  %v1467_v51 = vadd.f32 %v2963_v47, %v3785_v6  ;;  %v1531_v52 = vadd.f32 %v3027_v48, %v3785_v6  ;;  %v968_v53 = vpop.f32.mrb[7].mxu0  ;;  %v1224_v54 = vpop.f32.mrb[7].mxu1 }
 0x155   : > { %v1592_v55 = vmax.f32 %v1464_v45, 0.0  ;;  %v1656_v56 = vmax.f32 %v1528_v46, 0.0  ;;  %v1465_v57 = vadd.f32 %v3785_v6, %v968_v53  ;;  %v1529_v58 = vadd.f32 %v3785_v6, %v1224_v54 }
 0x156   : > { %v2763_v59 = vpack.c.bf16 %v1594_v49, %v1594_v49  ;;  %v2827_v60 = vpack.c.bf16 %v1658_v50, %v1658_v50  ;;  %v1595_v61 = vmax.f32 %v1467_v51, 0.0  ;;  %v1659_v62 = vmax.f32 %v1531_v52, 0.0 }
 0x157   : > { %v2761_v63 = vpack.c.bf16 %v1592_v55, %v1592_v55  ;;  %v2825_v0 = vpack.c.bf16 %v1656_v56, %v1656_v56  ;;  %v1593_v1 = vmax.f32 %v1465_v57, 0.0  ;;  %v1657_v2 = vmax.f32 %v1529_v58, 0.0 }
 0x158   : > { %2235 = vst.msk [vmem:[%s3797_s20 + $0x18] sm:$0xf] %vm2228_vm3, %v2763_v59  ;;  %2299 = vst.msk [vmem:[%s3797_s20 + $0x118] sm:$0xf] %vm2228_vm3, %v2827_v60  ;;  %v2764_v3 = vpack.c.bf16 %v1595_v61, %v1595_v61  ;;  %v2828_v4 = vpack.c.bf16 %v1659_v62, %v1659_v62 }
 0x159   : > { %2233 = vst.msk [vmem:[%s3797_s20 + $0x10] sm:$0xf] %vm2228_vm3, %v2761_v63  ;;  %2297 = vst.msk [vmem:[%s3797_s20 + $0x110] sm:$0xf] %vm2228_vm3, %v2825_v0  ;;  %v2762_v5 = vpack.c.bf16 %v1593_v1, %v1593_v1  ;;  %v2826_v7 = vpack.c.bf16 %v1657_v2, %v1657_v2  ;;  %v2966_v8 = vpop.f32.mrb[8].mxu0  ;;  %v3030_v9 = vpop.f32.mrb[8].mxu1 }
 0x15a   : > { %2236 = vst.msk [vmem:[%s3797_s20 + $0x1c] sm:$0xf] %vm2228_vm3, %v2764_v3  ;;  %2300 = vst.msk [vmem:[%s3797_s20 + $0x11c] sm:$0xf] %vm2228_vm3, %v2828_v4  ;;  %v1470_v10 = vadd.f32 %v2966_v8, %v3785_v6  ;;  %v1534_v11 = vadd.f32 %v3030_v9, %v3785_v6  ;;  %v981_v12 = vpop.f32.mrb[9].mxu0  ;;  %v1237_v13 = vpop.f32.mrb[9].mxu1 }
 0x15b   : > { %2234 = vst.msk [vmem:[%s3797_s20 + $0x14] sm:$0xf] %vm2228_vm3, %v2762_v5  ;;  %2298 = vst.msk [vmem:[%s3797_s20 + $0x114] sm:$0xf] %vm2228_vm3, %v2826_v7  ;;  %v1468_v14 = vadd.f32 %v3785_v6, %v981_v12  ;;  %v1532_v15 = vadd.f32 %v3785_v6, %v1237_v13  ;;  %v2967_v16 = vpop.f32.mrb[10].mxu0  ;;  %v3031_v17 = vpop.f32.mrb[10].mxu1 }
 0x15c   : > { %v1598_v18 = vmax.f32 %v1470_v10, 0.0  ;;  %v1662_v19 = vmax.f32 %v1534_v11, 0.0  ;;  %v1471_v20 = vadd.f32 %v2967_v16, %v3785_v6  ;;  %v1535_v21 = vadd.f32 %v3031_v17, %v3785_v6  ;;  %v984_v22 = vpop.f32.mrb[11].mxu0  ;;  %v1240_v23 = vpop.f32.mrb[11].mxu1 }
 0x15d   : > { %v1596_v24 = vmax.f32 %v1468_v14, 0.0  ;;  %v1660_v25 = vmax.f32 %v1532_v15, 0.0  ;;  %v1469_v26 = vadd.f32 %v3785_v6, %v984_v22  ;;  %v1533_v27 = vadd.f32 %v3785_v6, %v1240_v23 }
 0x15e   : > { %v2767_v28 = vpack.c.bf16 %v1598_v18, %v1598_v18  ;;  %v2831_v29 = vpack.c.bf16 %v1662_v19, %v1662_v19  ;;  %v1599_v30 = vmax.f32 %v1471_v20, 0.0  ;;  %v1663_v31 = vmax.f32 %v1535_v21, 0.0 }
 0x15f   : > { %v2765_v32 = vpack.c.bf16 %v1596_v24, %v1596_v24  ;;  %v2829_v33 = vpack.c.bf16 %v1660_v25, %v1660_v25  ;;  %v1597_v34 = vmax.f32 %v1469_v26, 0.0  ;;  %v1661_v35 = vmax.f32 %v1533_v27, 0.0 }
 0x160   : > { %2239 = vst.msk [vmem:[%s3797_s20 + $0x28] sm:$0xf] %vm2228_vm3, %v2767_v28  ;;  %2303 = vst.msk [vmem:[%s3797_s20 + $0x128] sm:$0xf] %vm2228_vm3, %v2831_v29  ;;  %v2768_v36 = vpack.c.bf16 %v1599_v30, %v1599_v30  ;;  %v2832_v37 = vpack.c.bf16 %v1663_v31, %v1663_v31 }
 0x161   : > { %2237 = vst.msk [vmem:[%s3797_s20 + $0x20] sm:$0xf] %vm2228_vm3, %v2765_v32  ;;  %2301 = vst.msk [vmem:[%s3797_s20 + $0x120] sm:$0xf] %vm2228_vm3, %v2829_v33  ;;  %v2766_v38 = vpack.c.bf16 %v1597_v34, %v1597_v34  ;;  %v2830_v39 = vpack.c.bf16 %v1661_v35, %v1661_v35  ;;  %v2970_v40 = vpop.f32.mrb[12].mxu0  ;;  %v3034_v41 = vpop.f32.mrb[12].mxu1 }
 0x162   : > { %2240 = vst.msk [vmem:[%s3797_s20 + $0x2c] sm:$0xf] %vm2228_vm3, %v2768_v36  ;;  %2304 = vst.msk [vmem:[%s3797_s20 + $0x12c] sm:$0xf] %vm2228_vm3, %v2832_v37  ;;  %v1474_v42 = vadd.f32 %v2970_v40, %v3785_v6  ;;  %v1538_v43 = vadd.f32 %v3034_v41, %v3785_v6  ;;  %v997_v44 = vpop.f32.mrb[13].mxu0  ;;  %v1253_v45 = vpop.f32.mrb[13].mxu1 }
 0x163   : > { %2238 = vst.msk [vmem:[%s3797_s20 + $0x24] sm:$0xf] %vm2228_vm3, %v2766_v38  ;;  %2302 = vst.msk [vmem:[%s3797_s20 + $0x124] sm:$0xf] %vm2228_vm3, %v2830_v39  ;;  %v1472_v46 = vadd.f32 %v3785_v6, %v997_v44  ;;  %v1536_v47 = vadd.f32 %v3785_v6, %v1253_v45  ;;  %v2971_v48 = vpop.f32.mrb[14].mxu0  ;;  %v3035_v49 = vpop.f32.mrb[14].mxu1 }
 0x164   : > { %v1602_v50 = vmax.f32 %v1474_v42, 0.0  ;;  %v1666_v51 = vmax.f32 %v1538_v43, 0.0  ;;  %v1475_v52 = vadd.f32 %v2971_v48, %v3785_v6  ;;  %v1539_v53 = vadd.f32 %v3035_v49, %v3785_v6  ;;  %v1000_v54 = vpop.f32.mrb[15].mxu0  ;;  %v1256_v55 = vpop.f32.mrb[15].mxu1 }
 0x165   : > { %v1600_v56 = vmax.f32 %v1472_v46, 0.0  ;;  %v1664_v57 = vmax.f32 %v1536_v47, 0.0  ;;  %v1473_v58 = vadd.f32 %v3785_v6, %v1000_v54  ;;  %v1537_v59 = vadd.f32 %v3785_v6, %v1256_v55 }
 0x166   : > { %v2771_v60 = vpack.c.bf16 %v1602_v50, %v1602_v50  ;;  %v2835_v61 = vpack.c.bf16 %v1666_v51, %v1666_v51  ;;  %v1603_v62 = vmax.f32 %v1475_v52, 0.0  ;;  %v1667_v63 = vmax.f32 %v1539_v53, 0.0 }
 0x167   : > { %v2769_v0 = vpack.c.bf16 %v1600_v56, %v1600_v56  ;;  %v2833_v1 = vpack.c.bf16 %v1664_v57, %v1664_v57  ;;  %v1601_v2 = vmax.f32 %v1473_v58, 0.0  ;;  %v1665_v3 = vmax.f32 %v1537_v59, 0.0 }
 0x168   : > { %2243 = vst.msk [vmem:[%s3797_s20 + $0x38] sm:$0xf] %vm2228_vm3, %v2771_v60  ;;  %2307 = vst.msk [vmem:[%s3797_s20 + $0x138] sm:$0xf] %vm2228_vm3, %v2835_v61  ;;  %v2772_v4 = vpack.c.bf16 %v1603_v62, %v1603_v62  ;;  %v2836_v5 = vpack.c.bf16 %v1667_v63, %v1667_v63 }
 0x169   : > { %2241 = vst.msk [vmem:[%s3797_s20 + $0x30] sm:$0xf] %vm2228_vm3, %v2769_v0  ;;  %2305 = vst.msk [vmem:[%s3797_s20 + $0x130] sm:$0xf] %vm2228_vm3, %v2833_v1  ;;  %v2770_v7 = vpack.c.bf16 %v1601_v2, %v1601_v2  ;;  %v2834_v8 = vpack.c.bf16 %v1665_v3, %v1665_v3  ;;  %v2974_v9 = vpop.f32.mrb[16].mxu0  ;;  %v3038_v10 = vpop.f32.mrb[16].mxu1 }
 0x16a   : > { %2244 = vst.msk [vmem:[%s3797_s20 + $0x3c] sm:$0xf] %vm2228_vm3, %v2772_v4  ;;  %2308 = vst.msk [vmem:[%s3797_s20 + $0x13c] sm:$0xf] %vm2228_vm3, %v2836_v5  ;;  %v1478_v11 = vadd.f32 %v2974_v9, %v3785_v6  ;;  %v1542_v12 = vadd.f32 %v3038_v10, %v3785_v6  ;;  %v1013_v13 = vpop.f32.mrb[17].mxu0  ;;  %v1269_v14 = vpop.f32.mrb[17].mxu1 }
 0x16b   : > { %2242 = vst.msk [vmem:[%s3797_s20 + $0x34] sm:$0xf] %vm2228_vm3, %v2770_v7  ;;  %2306 = vst.msk [vmem:[%s3797_s20 + $0x134] sm:$0xf] %vm2228_vm3, %v2834_v8  ;;  %v1476_v15 = vadd.f32 %v3785_v6, %v1013_v13  ;;  %v1540_v16 = vadd.f32 %v3785_v6, %v1269_v14  ;;  %v2975_v17 = vpop.f32.mrb[18].mxu0  ;;  %v3039_v18 = vpop.f32.mrb[18].mxu1 }
 0x16c   : > { %v1606_v19 = vmax.f32 %v1478_v11, 0.0  ;;  %v1670_v20 = vmax.f32 %v1542_v12, 0.0  ;;  %v1479_v21 = vadd.f32 %v2975_v17, %v3785_v6  ;;  %v1543_v22 = vadd.f32 %v3039_v18, %v3785_v6  ;;  %v1016_v23 = vpop.f32.mrb[19].mxu0  ;;  %v1272_v24 = vpop.f32.mrb[19].mxu1 }
 0x16d   : > { %v1604_v25 = vmax.f32 %v1476_v15, 0.0  ;;  %v1668_v26 = vmax.f32 %v1540_v16, 0.0  ;;  %v1477_v27 = vadd.f32 %v3785_v6, %v1016_v23  ;;  %v1541_v28 = vadd.f32 %v3785_v6, %v1272_v24 }
 0x16e   : > { %v2775_v29 = vpack.c.bf16 %v1606_v19, %v1606_v19  ;;  %v2839_v30 = vpack.c.bf16 %v1670_v20, %v1670_v20  ;;  %v1607_v31 = vmax.f32 %v1479_v21, 0.0  ;;  %v1671_v32 = vmax.f32 %v1543_v22, 0.0 }
 0x16f   : > { %v2773_v33 = vpack.c.bf16 %v1604_v25, %v1604_v25  ;;  %v2837_v34 = vpack.c.bf16 %v1668_v26, %v1668_v26  ;;  %v1605_v35 = vmax.f32 %v1477_v27, 0.0  ;;  %v1669_v36 = vmax.f32 %v1541_v28, 0.0 }
 0x170   : > { %2247 = vst.msk [vmem:[%s3797_s20 + $0x48] sm:$0xf] %vm2228_vm3, %v2775_v29  ;;  %2311 = vst.msk [vmem:[%s3797_s20 + $0x148] sm:$0xf] %vm2228_vm3, %v2839_v30  ;;  %v2776_v37 = vpack.c.bf16 %v1607_v31, %v1607_v31  ;;  %v2840_v38 = vpack.c.bf16 %v1671_v32, %v1671_v32 }
 0x171   : > { %2245 = vst.msk [vmem:[%s3797_s20 + $0x40] sm:$0xf] %vm2228_vm3, %v2773_v33  ;;  %2309 = vst.msk [vmem:[%s3797_s20 + $0x140] sm:$0xf] %vm2228_vm3, %v2837_v34  ;;  %v2774_v39 = vpack.c.bf16 %v1605_v35, %v1605_v35  ;;  %v2838_v40 = vpack.c.bf16 %v1669_v36, %v1669_v36  ;;  %v2978_v41 = vpop.f32.mrb[20].mxu0  ;;  %v3042_v42 = vpop.f32.mrb[20].mxu1 }
 0x172   : > { %2248 = vst.msk [vmem:[%s3797_s20 + $0x4c] sm:$0xf] %vm2228_vm3, %v2776_v37  ;;  %2312 = vst.msk [vmem:[%s3797_s20 + $0x14c] sm:$0xf] %vm2228_vm3, %v2840_v38  ;;  %v1482_v43 = vadd.f32 %v2978_v41, %v3785_v6  ;;  %v1546_v44 = vadd.f32 %v3042_v42, %v3785_v6  ;;  %v1029_v45 = vpop.f32.mrb[21].mxu0  ;;  %v1285_v46 = vpop.f32.mrb[21].mxu1 }
 0x173   : > { %2246 = vst.msk [vmem:[%s3797_s20 + $0x44] sm:$0xf] %vm2228_vm3, %v2774_v39  ;;  %2310 = vst.msk [vmem:[%s3797_s20 + $0x144] sm:$0xf] %vm2228_vm3, %v2838_v40  ;;  %v1480_v47 = vadd.f32 %v3785_v6, %v1029_v45  ;;  %v1544_v48 = vadd.f32 %v3785_v6, %v1285_v46  ;;  %v2979_v49 = vpop.f32.mrb[22].mxu0  ;;  %v3043_v50 = vpop.f32.mrb[22].mxu1 }
 0x174   : > { %v1610_v51 = vmax.f32 %v1482_v43, 0.0  ;;  %v1674_v52 = vmax.f32 %v1546_v44, 0.0  ;;  %v1483_v53 = vadd.f32 %v2979_v49, %v3785_v6  ;;  %v1547_v54 = vadd.f32 %v3043_v50, %v3785_v6  ;;  %v1032_v55 = vpop.f32.mrb[23].mxu0  ;;  %v1288_v56 = vpop.f32.mrb[23].mxu1 }
 0x175   : > { %v1608_v57 = vmax.f32 %v1480_v47, 0.0  ;;  %v1672_v58 = vmax.f32 %v1544_v48, 0.0  ;;  %v1481_v59 = vadd.f32 %v3785_v6, %v1032_v55  ;;  %v1545_v60 = vadd.f32 %v3785_v6, %v1288_v56 }
 0x176   : > { %v2779_v61 = vpack.c.bf16 %v1610_v51, %v1610_v51  ;;  %v2843_v62 = vpack.c.bf16 %v1674_v52, %v1674_v52  ;;  %v1611_v63 = vmax.f32 %v1483_v53, 0.0  ;;  %v1675_v0 = vmax.f32 %v1547_v54, 0.0 }
 0x177   : > { %v2777_v1 = vpack.c.bf16 %v1608_v57, %v1608_v57  ;;  %v2841_v2 = vpack.c.bf16 %v1672_v58, %v1672_v58  ;;  %v1609_v3 = vmax.f32 %v1481_v59, 0.0  ;;  %v1673_v4 = vmax.f32 %v1545_v60, 0.0 }
 0x178   : > { %2251 = vst.msk [vmem:[%s3797_s20 + $0x58] sm:$0xf] %vm2228_vm3, %v2779_v61  ;;  %2315 = vst.msk [vmem:[%s3797_s20 + $0x158] sm:$0xf] %vm2228_vm3, %v2843_v62  ;;  %v2780_v5 = vpack.c.bf16 %v1611_v63, %v1611_v63  ;;  %v2844_v7 = vpack.c.bf16 %v1675_v0, %v1675_v0 }
 0x179   : > { %2249 = vst.msk [vmem:[%s3797_s20 + $0x50] sm:$0xf] %vm2228_vm3, %v2777_v1  ;;  %2313 = vst.msk [vmem:[%s3797_s20 + $0x150] sm:$0xf] %vm2228_vm3, %v2841_v2  ;;  %v2778_v8 = vpack.c.bf16 %v1609_v3, %v1609_v3  ;;  %v2842_v9 = vpack.c.bf16 %v1673_v4, %v1673_v4  ;;  %v2982_v10 = vpop.f32.mrb[24].mxu0  ;;  %v3046_v11 = vpop.f32.mrb[24].mxu1 }
 0x17a   : > { %2252 = vst.msk [vmem:[%s3797_s20 + $0x5c] sm:$0xf] %vm2228_vm3, %v2780_v5  ;;  %2316 = vst.msk [vmem:[%s3797_s20 + $0x15c] sm:$0xf] %vm2228_vm3, %v2844_v7  ;;  %v1486_v12 = vadd.f32 %v2982_v10, %v3785_v6  ;;  %v1550_v13 = vadd.f32 %v3046_v11, %v3785_v6  ;;  %v1045_v14 = vpop.f32.mrb[25].mxu0  ;;  %v1301_v15 = vpop.f32.mrb[25].mxu1 }
 0x17b   : > { %2250 = vst.msk [vmem:[%s3797_s20 + $0x54] sm:$0xf] %vm2228_vm3, %v2778_v8  ;;  %2314 = vst.msk [vmem:[%s3797_s20 + $0x154] sm:$0xf] %vm2228_vm3, %v2842_v9  ;;  %v1484_v16 = vadd.f32 %v3785_v6, %v1045_v14  ;;  %v1548_v17 = vadd.f32 %v3785_v6, %v1301_v15  ;;  %v2983_v18 = vpop.f32.mrb[26].mxu0  ;;  %v3047_v19 = vpop.f32.mrb[26].mxu1 }
 0x17c   : > { %v1614_v20 = vmax.f32 %v1486_v12, 0.0  ;;  %v1678_v21 = vmax.f32 %v1550_v13, 0.0  ;;  %v1487_v22 = vadd.f32 %v2983_v18, %v3785_v6  ;;  %v1551_v23 = vadd.f32 %v3047_v19, %v3785_v6  ;;  %v1048_v24 = vpop.f32.mrb[27].mxu0  ;;  %v1304_v25 = vpop.f32.mrb[27].mxu1 }
 0x17d   : > { %v1612_v26 = vmax.f32 %v1484_v16, 0.0  ;;  %v1676_v27 = vmax.f32 %v1548_v17, 0.0  ;;  %v1485_v28 = vadd.f32 %v3785_v6, %v1048_v24  ;;  %v1549_v29 = vadd.f32 %v3785_v6, %v1304_v25 }
 0x17e   : > { %v2783_v30 = vpack.c.bf16 %v1614_v20, %v1614_v20  ;;  %v2847_v31 = vpack.c.bf16 %v1678_v21, %v1678_v21  ;;  %v1615_v32 = vmax.f32 %v1487_v22, 0.0  ;;  %v1679_v33 = vmax.f32 %v1551_v23, 0.0 }
 0x17f   : > { %v2781_v34 = vpack.c.bf16 %v1612_v26, %v1612_v26  ;;  %v2845_v35 = vpack.c.bf16 %v1676_v27, %v1676_v27  ;;  %v1613_v36 = vmax.f32 %v1485_v28, 0.0  ;;  %v1677_v37 = vmax.f32 %v1549_v29, 0.0 }
 0x180   : > { %2255 = vst.msk [vmem:[%s3797_s20 + $0x68] sm:$0xf] %vm2228_vm3, %v2783_v30  ;;  %2319 = vst.msk [vmem:[%s3797_s20 + $0x168] sm:$0xf] %vm2228_vm3, %v2847_v31  ;;  %v2784_v38 = vpack.c.bf16 %v1615_v32, %v1615_v32  ;;  %v2848_v39 = vpack.c.bf16 %v1679_v33, %v1679_v33 }
 0x181   : > { %2253 = vst.msk [vmem:[%s3797_s20 + $0x60] sm:$0xf] %vm2228_vm3, %v2781_v34  ;;  %2317 = vst.msk [vmem:[%s3797_s20 + $0x160] sm:$0xf] %vm2228_vm3, %v2845_v35  ;;  %v2782_v40 = vpack.c.bf16 %v1613_v36, %v1613_v36  ;;  %v2846_v41 = vpack.c.bf16 %v1677_v37, %v1677_v37  ;;  %v2986_v42 = vpop.f32.mrb[28].mxu0  ;;  %v3050_v43 = vpop.f32.mrb[28].mxu1 }
 0x182   : > { %2256 = vst.msk [vmem:[%s3797_s20 + $0x6c] sm:$0xf] %vm2228_vm3, %v2784_v38  ;;  %2320 = vst.msk [vmem:[%s3797_s20 + $0x16c] sm:$0xf] %vm2228_vm3, %v2848_v39  ;;  %v1490_v44 = vadd.f32 %v2986_v42, %v3785_v6  ;;  %v1554_v45 = vadd.f32 %v3050_v43, %v3785_v6  ;;  %v1061_v46 = vpop.f32.mrb[29].mxu0  ;;  %v1317_v47 = vpop.f32.mrb[29].mxu1 }
 0x183   : > { %2254 = vst.msk [vmem:[%s3797_s20 + $0x64] sm:$0xf] %vm2228_vm3, %v2782_v40  ;;  %2318 = vst.msk [vmem:[%s3797_s20 + $0x164] sm:$0xf] %vm2228_vm3, %v2846_v41  ;;  %v1488_v48 = vadd.f32 %v3785_v6, %v1061_v46  ;;  %v1552_v49 = vadd.f32 %v3785_v6, %v1317_v47  ;;  %v2987_v50 = vpop.f32.mrb[30].mxu0  ;;  %v3051_v51 = vpop.f32.mrb[30].mxu1 }
 0x184   : > { %v1618_v52 = vmax.f32 %v1490_v44, 0.0  ;;  %v1682_v53 = vmax.f32 %v1554_v45, 0.0  ;;  %v1491_v54 = vadd.f32 %v2987_v50, %v3785_v6  ;;  %v1555_v55 = vadd.f32 %v3051_v51, %v3785_v6  ;;  %v1064_v56 = vpop.f32.mrb[31].mxu0  ;;  %v1320_v57 = vpop.f32.mrb[31].mxu1 }
 0x185   : > { %v1616_v58 = vmax.f32 %v1488_v48, 0.0  ;;  %v1680_v59 = vmax.f32 %v1552_v49, 0.0  ;;  %v1489_v60 = vadd.f32 %v3785_v6, %v1064_v56  ;;  %v1553_v61 = vadd.f32 %v3785_v6, %v1320_v57 }
 0x186   : > { %v2787_v62 = vpack.c.bf16 %v1618_v52, %v1618_v52  ;;  %v2851_v63 = vpack.c.bf16 %v1682_v53, %v1682_v53  ;;  %v1619_v0 = vmax.f32 %v1491_v54, 0.0  ;;  %v1683_v1 = vmax.f32 %v1555_v55, 0.0 }
 0x187   : > { %v2785_v2 = vpack.c.bf16 %v1616_v58, %v1616_v58  ;;  %v2849_v3 = vpack.c.bf16 %v1680_v59, %v1680_v59  ;;  %v1617_v4 = vmax.f32 %v1489_v60, 0.0  ;;  %v1681_v5 = vmax.f32 %v1553_v61, 0.0 }
 0x188   : > { %2259 = vst.msk [vmem:[%s3797_s20 + $0x78] sm:$0xf] %vm2228_vm3, %v2787_v62  ;;  %2323 = vst.msk [vmem:[%s3797_s20 + $0x178] sm:$0xf] %vm2228_vm3, %v2851_v63  ;;  %v2788_v7 = vpack.c.bf16 %v1619_v0, %v1619_v0  ;;  %v2852_v8 = vpack.c.bf16 %v1683_v1, %v1683_v1 }
 0x189   : > { %2257 = vst.msk [vmem:[%s3797_s20 + $0x70] sm:$0xf] %vm2228_vm3, %v2785_v2  ;;  %2321 = vst.msk [vmem:[%s3797_s20 + $0x170] sm:$0xf] %vm2228_vm3, %v2849_v3  ;;  %v2786_v9 = vpack.c.bf16 %v1617_v4, %v1617_v4  ;;  %v2850_v10 = vpack.c.bf16 %v1681_v5, %v1681_v5  ;;  %v2990_v11 = vpop.f32.mrb[32].mxu0  ;;  %v3054_v12 = vpop.f32.mrb[32].mxu1 }
 0x18a   : > { %2260 = vst.msk [vmem:[%s3797_s20 + $0x7c] sm:$0xf] %vm2228_vm3, %v2788_v7  ;;  %2324 = vst.msk [vmem:[%s3797_s20 + $0x17c] sm:$0xf] %vm2228_vm3, %v2852_v8  ;;  %v1494_v13 = vadd.f32 %v2990_v11, %v3785_v6  ;;  %v1558_v14 = vadd.f32 %v3054_v12, %v3785_v6  ;;  %v1077_v15 = vpop.f32.mrb[33].mxu0  ;;  %v1333_v16 = vpop.f32.mrb[33].mxu1 }
 0x18b   : > { %2258 = vst.msk [vmem:[%s3797_s20 + $0x74] sm:$0xf] %vm2228_vm3, %v2786_v9  ;;  %2322 = vst.msk [vmem:[%s3797_s20 + $0x174] sm:$0xf] %vm2228_vm3, %v2850_v10  ;;  %v1492_v17 = vadd.f32 %v3785_v6, %v1077_v15  ;;  %v1556_v18 = vadd.f32 %v3785_v6, %v1333_v16  ;;  %v2991_v19 = vpop.f32.mrb[34].mxu0  ;;  %v3055_v20 = vpop.f32.mrb[34].mxu1 }
 0x18c   : > { %v1622_v21 = vmax.f32 %v1494_v13, 0.0  ;;  %v1686_v22 = vmax.f32 %v1558_v14, 0.0  ;;  %v1495_v23 = vadd.f32 %v2991_v19, %v3785_v6  ;;  %v1559_v24 = vadd.f32 %v3055_v20, %v3785_v6  ;;  %v1080_v25 = vpop.f32.mrb[35].mxu0  ;;  %v1336_v26 = vpop.f32.mrb[35].mxu1 }
 0x18d   : > { %v1620_v27 = vmax.f32 %v1492_v17, 0.0  ;;  %v1684_v28 = vmax.f32 %v1556_v18, 0.0  ;;  %v1493_v29 = vadd.f32 %v3785_v6, %v1080_v25  ;;  %v1557_v30 = vadd.f32 %v3785_v6, %v1336_v26 }
 0x18e   : > { %v2791_v31 = vpack.c.bf16 %v1622_v21, %v1622_v21  ;;  %v2855_v32 = vpack.c.bf16 %v1686_v22, %v1686_v22  ;;  %v1623_v33 = vmax.f32 %v1495_v23, 0.0  ;;  %v1687_v34 = vmax.f32 %v1559_v24, 0.0 }
 0x18f   : > { %v2789_v35 = vpack.c.bf16 %v1620_v27, %v1620_v27  ;;  %v2853_v36 = vpack.c.bf16 %v1684_v28, %v1684_v28  ;;  %v1621_v37 = vmax.f32 %v1493_v29, 0.0  ;;  %v1685_v38 = vmax.f32 %v1557_v30, 0.0 }
 0x190   : > { %2263 = vst.msk [vmem:[%s3797_s20 + $0x88] sm:$0xf] %vm2228_vm3, %v2791_v31  ;;  %2327 = vst.msk [vmem:[%s3797_s20 + $0x188] sm:$0xf] %vm2228_vm3, %v2855_v32  ;;  %v2792_v39 = vpack.c.bf16 %v1623_v33, %v1623_v33  ;;  %v2856_v40 = vpack.c.bf16 %v1687_v34, %v1687_v34 }
 0x191   : > { %2261 = vst.msk [vmem:[%s3797_s20 + $0x80] sm:$0xf] %vm2228_vm3, %v2789_v35  ;;  %2325 = vst.msk [vmem:[%s3797_s20 + $0x180] sm:$0xf] %vm2228_vm3, %v2853_v36  ;;  %v2790_v41 = vpack.c.bf16 %v1621_v37, %v1621_v37  ;;  %v2854_v42 = vpack.c.bf16 %v1685_v38, %v1685_v38  ;;  %v2994_v43 = vpop.f32.mrb[36].mxu0  ;;  %v3058_v44 = vpop.f32.mrb[36].mxu1 }
 0x192   : > { %2264 = vst.msk [vmem:[%s3797_s20 + $0x8c] sm:$0xf] %vm2228_vm3, %v2792_v39  ;;  %2328 = vst.msk [vmem:[%s3797_s20 + $0x18c] sm:$0xf] %vm2228_vm3, %v2856_v40  ;;  %v1498_v45 = vadd.f32 %v2994_v43, %v3785_v6  ;;  %v1562_v46 = vadd.f32 %v3058_v44, %v3785_v6  ;;  %v1093_v47 = vpop.f32.mrb[37].mxu0  ;;  %v1349_v48 = vpop.f32.mrb[37].mxu1 }
 0x193   : > { %2262 = vst.msk [vmem:[%s3797_s20 + $0x84] sm:$0xf] %vm2228_vm3, %v2790_v41  ;;  %2326 = vst.msk [vmem:[%s3797_s20 + $0x184] sm:$0xf] %vm2228_vm3, %v2854_v42  ;;  %v1496_v49 = vadd.f32 %v3785_v6, %v1093_v47  ;;  %v1560_v50 = vadd.f32 %v3785_v6, %v1349_v48  ;;  %v2995_v51 = vpop.f32.mrb[38].mxu0  ;;  %v3059_v52 = vpop.f32.mrb[38].mxu1 }
 0x194   : > { %v1626_v53 = vmax.f32 %v1498_v45, 0.0  ;;  %v1690_v54 = vmax.f32 %v1562_v46, 0.0  ;;  %v1499_v55 = vadd.f32 %v2995_v51, %v3785_v6  ;;  %v1563_v56 = vadd.f32 %v3059_v52, %v3785_v6  ;;  %v1096_v57 = vpop.f32.mrb[39].mxu0  ;;  %v1352_v58 = vpop.f32.mrb[39].mxu1 }
 0x195   : > { %v1624_v59 = vmax.f32 %v1496_v49, 0.0  ;;  %v1688_v60 = vmax.f32 %v1560_v50, 0.0  ;;  %v1497_v61 = vadd.f32 %v3785_v6, %v1096_v57  ;;  %v1561_v62 = vadd.f32 %v3785_v6, %v1352_v58 }
 0x196   : > { %v2795_v63 = vpack.c.bf16 %v1626_v53, %v1626_v53  ;;  %v2859_v0 = vpack.c.bf16 %v1690_v54, %v1690_v54  ;;  %v1627_v1 = vmax.f32 %v1499_v55, 0.0  ;;  %v1691_v2 = vmax.f32 %v1563_v56, 0.0 }
 0x197   : > { %v2793_v3 = vpack.c.bf16 %v1624_v59, %v1624_v59  ;;  %v2857_v4 = vpack.c.bf16 %v1688_v60, %v1688_v60  ;;  %v1625_v5 = vmax.f32 %v1497_v61, 0.0  ;;  %v1689_v7 = vmax.f32 %v1561_v62, 0.0 }
 0x198   : > { %2267 = vst.msk [vmem:[%s3797_s20 + $0x98] sm:$0xf] %vm2228_vm3, %v2795_v63  ;;  %2331 = vst.msk [vmem:[%s3797_s20 + $0x198] sm:$0xf] %vm2228_vm3, %v2859_v0  ;;  %v2796_v8 = vpack.c.bf16 %v1627_v1, %v1627_v1  ;;  %v2860_v9 = vpack.c.bf16 %v1691_v2, %v1691_v2 }
 0x199   : > { %2265 = vst.msk [vmem:[%s3797_s20 + $0x90] sm:$0xf] %vm2228_vm3, %v2793_v3  ;;  %2329 = vst.msk [vmem:[%s3797_s20 + $0x190] sm:$0xf] %vm2228_vm3, %v2857_v4  ;;  %v2794_v10 = vpack.c.bf16 %v1625_v5, %v1625_v5  ;;  %v2858_v11 = vpack.c.bf16 %v1689_v7, %v1689_v7  ;;  %v2998_v12 = vpop.f32.mrb[40].mxu0  ;;  %v3062_v13 = vpop.f32.mrb[40].mxu1 }
 0x19a   : > { %2268 = vst.msk [vmem:[%s3797_s20 + $0x9c] sm:$0xf] %vm2228_vm3, %v2796_v8  ;;  %2332 = vst.msk [vmem:[%s3797_s20 + $0x19c] sm:$0xf] %vm2228_vm3, %v2860_v9  ;;  %v1502_v14 = vadd.f32 %v2998_v12, %v3785_v6  ;;  %v1566_v15 = vadd.f32 %v3062_v13, %v3785_v6  ;;  %v1109_v16 = vpop.f32.mrb[41].mxu0  ;;  %v1365_v17 = vpop.f32.mrb[41].mxu1 }
 0x19b   : > { %2266 = vst.msk [vmem:[%s3797_s20 + $0x94] sm:$0xf] %vm2228_vm3, %v2794_v10  ;;  %2330 = vst.msk [vmem:[%s3797_s20 + $0x194] sm:$0xf] %vm2228_vm3, %v2858_v11  ;;  %v1500_v18 = vadd.f32 %v3785_v6, %v1109_v16  ;;  %v1564_v19 = vadd.f32 %v3785_v6, %v1365_v17  ;;  %v2999_v20 = vpop.f32.mrb[42].mxu0  ;;  %v3063_v21 = vpop.f32.mrb[42].mxu1 }
 0x19c   : > { %v1630_v22 = vmax.f32 %v1502_v14, 0.0  ;;  %v1694_v23 = vmax.f32 %v1566_v15, 0.0  ;;  %v1503_v24 = vadd.f32 %v2999_v20, %v3785_v6  ;;  %v1567_v25 = vadd.f32 %v3063_v21, %v3785_v6  ;;  %v1112_v26 = vpop.f32.mrb[43].mxu0  ;;  %v1368_v27 = vpop.f32.mrb[43].mxu1 }
 0x19d   : > { %v1628_v28 = vmax.f32 %v1500_v18, 0.0  ;;  %v1692_v29 = vmax.f32 %v1564_v19, 0.0  ;;  %v1501_v30 = vadd.f32 %v3785_v6, %v1112_v26  ;;  %v1565_v31 = vadd.f32 %v3785_v6, %v1368_v27 }
 0x19e   : > { %v2799_v32 = vpack.c.bf16 %v1630_v22, %v1630_v22  ;;  %v2863_v33 = vpack.c.bf16 %v1694_v23, %v1694_v23  ;;  %v1631_v34 = vmax.f32 %v1503_v24, 0.0  ;;  %v1695_v35 = vmax.f32 %v1567_v25, 0.0 }
 0x19f   : > { %v2797_v36 = vpack.c.bf16 %v1628_v28, %v1628_v28  ;;  %v2861_v37 = vpack.c.bf16 %v1692_v29, %v1692_v29  ;;  %v1629_v38 = vmax.f32 %v1501_v30, 0.0  ;;  %v1693_v39 = vmax.f32 %v1565_v31, 0.0 }
 0x1a0   : > { %2271 = vst.msk [vmem:[%s3797_s20 + $0xa8] sm:$0xf] %vm2228_vm3, %v2799_v32  ;;  %2335 = vst.msk [vmem:[%s3797_s20 + $0x1a8] sm:$0xf] %vm2228_vm3, %v2863_v33  ;;  %v2800_v40 = vpack.c.bf16 %v1631_v34, %v1631_v34  ;;  %v2864_v41 = vpack.c.bf16 %v1695_v35, %v1695_v35 }
 0x1a1   : > { %2269 = vst.msk [vmem:[%s3797_s20 + $0xa0] sm:$0xf] %vm2228_vm3, %v2797_v36  ;;  %2333 = vst.msk [vmem:[%s3797_s20 + $0x1a0] sm:$0xf] %vm2228_vm3, %v2861_v37  ;;  %v2798_v42 = vpack.c.bf16 %v1629_v38, %v1629_v38  ;;  %v2862_v43 = vpack.c.bf16 %v1693_v39, %v1693_v39  ;;  %v3002_v44 = vpop.f32.mrb[44].mxu0  ;;  %v3066_v45 = vpop.f32.mrb[44].mxu1 }
 0x1a2   : > { %2272 = vst.msk [vmem:[%s3797_s20 + $0xac] sm:$0xf] %vm2228_vm3, %v2800_v40  ;;  %2336 = vst.msk [vmem:[%s3797_s20 + $0x1ac] sm:$0xf] %vm2228_vm3, %v2864_v41  ;;  %v1506_v46 = vadd.f32 %v3002_v44, %v3785_v6  ;;  %v1570_v47 = vadd.f32 %v3066_v45, %v3785_v6  ;;  %v1125_v48 = vpop.f32.mrb[45].mxu0  ;;  %v1381_v49 = vpop.f32.mrb[45].mxu1 }
 0x1a3   : > { %2270 = vst.msk [vmem:[%s3797_s20 + $0xa4] sm:$0xf] %vm2228_vm3, %v2798_v42  ;;  %2334 = vst.msk [vmem:[%s3797_s20 + $0x1a4] sm:$0xf] %vm2228_vm3, %v2862_v43  ;;  %v1504_v50 = vadd.f32 %v3785_v6, %v1125_v48  ;;  %v1568_v51 = vadd.f32 %v3785_v6, %v1381_v49  ;;  %v3003_v52 = vpop.f32.mrb[46].mxu0  ;;  %v3067_v53 = vpop.f32.mrb[46].mxu1 }
 0x1a4   : > { %v1634_v54 = vmax.f32 %v1506_v46, 0.0  ;;  %v1698_v55 = vmax.f32 %v1570_v47, 0.0  ;;  %v1507_v56 = vadd.f32 %v3003_v52, %v3785_v6  ;;  %v1571_v57 = vadd.f32 %v3067_v53, %v3785_v6  ;;  %v1128_v58 = vpop.f32.mrb[47].mxu0  ;;  %v1384_v59 = vpop.f32.mrb[47].mxu1  ;;  %v4099_v46 = vld [vmem:[#allocation7] ss:$0 sm:$0xff] }
 0x1a5   : > { %v1632_v60 = vmax.f32 %v1504_v50, 0.0  ;;  %v1696_v61 = vmax.f32 %v1568_v51, 0.0  ;;  %v1505_v62 = vadd.f32 %v3785_v6, %v1128_v58  ;;  %v1569_v63 = vadd.f32 %v3785_v6, %v1384_v59 }
 0x1a6   : > { %v2803_v0 = vpack.c.bf16 %v1634_v54, %v1634_v54  ;;  %v2867_v1 = vpack.c.bf16 %v1698_v55, %v1698_v55  ;;  %v1635_v2 = vmax.f32 %v1507_v56, 0.0  ;;  %v1699_v3 = vmax.f32 %v1571_v57, 0.0 }
 0x1a7   : > { %v2801_v4 = vpack.c.bf16 %v1632_v60, %v1632_v60  ;;  %v2865_v5 = vpack.c.bf16 %v1696_v61, %v1696_v61  ;;  %v1633_v7 = vmax.f32 %v1505_v62, 0.0  ;;  %v1697_v8 = vmax.f32 %v1569_v63, 0.0 }
 0x1a8   : > { %2275 = vst.msk [vmem:[%s3797_s20 + $0xb8] sm:$0xf] %vm2228_vm3, %v2803_v0  ;;  %2339 = vst.msk [vmem:[%s3797_s20 + $0x1b8] sm:$0xf] %vm2228_vm3, %v2867_v1  ;;  %v2804_v9 = vpack.c.bf16 %v1635_v2, %v1635_v2  ;;  %v2868_v10 = vpack.c.bf16 %v1699_v3, %v1699_v3 }
 0x1a9   : > { %2273 = vst.msk [vmem:[%s3797_s20 + $0xb0] sm:$0xf] %vm2228_vm3, %v2801_v4  ;;  %2337 = vst.msk [vmem:[%s3797_s20 + $0x1b0] sm:$0xf] %vm2228_vm3, %v2865_v5  ;;  %v2802_v11 = vpack.c.bf16 %v1633_v7, %v1633_v7  ;;  %v2866_v12 = vpack.c.bf16 %v1697_v8, %v1697_v8  ;;  %v3006_v13 = vpop.f32.mrb[48].mxu0  ;;  %v3070_v14 = vpop.f32.mrb[48].mxu1 }
 0x1aa   : > { %2276 = vst.msk [vmem:[%s3797_s20 + $0xbc] sm:$0xf] %vm2228_vm3, %v2804_v9  ;;  %2340 = vst.msk [vmem:[%s3797_s20 + $0x1bc] sm:$0xf] %vm2228_vm3, %v2868_v10  ;;  %v1510_v15 = vadd.f32 %v3006_v13, %v3785_v6  ;;  %v1574_v16 = vadd.f32 %v3070_v14, %v3785_v6  ;;  %v1141_v17 = vpop.f32.mrb[49].mxu0  ;;  %v1397_v18 = vpop.f32.mrb[49].mxu1 }
 0x1ab   : > { %2274 = vst.msk [vmem:[%s3797_s20 + $0xb4] sm:$0xf] %vm2228_vm3, %v2802_v11  ;;  %2338 = vst.msk [vmem:[%s3797_s20 + $0x1b4] sm:$0xf] %vm2228_vm3, %v2866_v12  ;;  %v1508_v19 = vadd.f32 %v3785_v6, %v1141_v17  ;;  %v1572_v20 = vadd.f32 %v3785_v6, %v1397_v18  ;;  %v3007_v21 = vpop.f32.mrb[50].mxu0  ;;  %v3071_v22 = vpop.f32.mrb[50].mxu1 }
 0x1ac   : > { %v1638_v23 = vmax.f32 %v1510_v15, 0.0  ;;  %v1702_v24 = vmax.f32 %v1574_v16, 0.0  ;;  %v1511_v25 = vadd.f32 %v3007_v21, %v3785_v6  ;;  %v1575_v26 = vadd.f32 %v3071_v22, %v3785_v6  ;;  %v1144_v27 = vpop.f32.mrb[51].mxu0  ;;  %v1400_v28 = vpop.f32.mrb[51].mxu1 }
 0x1ad   : > { %v1636_v29 = vmax.f32 %v1508_v19, 0.0  ;;  %v1700_v30 = vmax.f32 %v1572_v20, 0.0  ;;  %v1509_v31 = vadd.f32 %v3785_v6, %v1144_v27  ;;  %v1573_v32 = vadd.f32 %v3785_v6, %v1400_v28 }
 0x1ae   : > { %v2807_v33 = vpack.c.bf16 %v1638_v23, %v1638_v23  ;;  %v2871_v34 = vpack.c.bf16 %v1702_v24, %v1702_v24  ;;  %v1639_v35 = vmax.f32 %v1511_v25, 0.0  ;;  %v1703_v36 = vmax.f32 %v1575_v26, 0.0 }
 0x1af   : > { %v2805_v37 = vpack.c.bf16 %v1636_v29, %v1636_v29  ;;  %v2869_v38 = vpack.c.bf16 %v1700_v30, %v1700_v30  ;;  %v1637_v39 = vmax.f32 %v1509_v31, 0.0  ;;  %v1701_v40 = vmax.f32 %v1573_v32, 0.0 }
 0x1b0   : > { %2279 = vst.msk [vmem:[%s3797_s20 + $0xc8] sm:$0xf] %vm2228_vm3, %v2807_v33  ;;  %2343 = vst.msk [vmem:[%s3797_s20 + $0x1c8] sm:$0xf] %vm2228_vm3, %v2871_v34  ;;  %v2808_v41 = vpack.c.bf16 %v1639_v35, %v1639_v35  ;;  %v2872_v42 = vpack.c.bf16 %v1703_v36, %v1703_v36 }
 0x1b1   : > { %2277 = vst.msk [vmem:[%s3797_s20 + $0xc0] sm:$0xf] %vm2228_vm3, %v2805_v37  ;;  %2341 = vst.msk [vmem:[%s3797_s20 + $0x1c0] sm:$0xf] %vm2228_vm3, %v2869_v38  ;;  %v2806_v6 = vpack.c.bf16 %v1637_v39, %v1637_v39  ;;  %v2870_v43 = vpack.c.bf16 %v1701_v40, %v1701_v40  ;;  %v3010_v44 = vpop.f32.mrb[52].mxu0  ;;  %v3074_v45 = vpop.f32.mrb[52].mxu1 }
 0x1b2   : > { %2280 = vst.msk [vmem:[%s3797_s20 + $0xcc] sm:$0xf] %vm2228_vm3, %v2808_v41  ;;  %2344 = vst.msk [vmem:[%s3797_s20 + $0x1cc] sm:$0xf] %vm2228_vm3, %v2872_v42  ;;  %v1514_v47 = vadd.f32 %v4099_v46, %v3010_v44  ;;  %v1578_v48 = vadd.f32 %v4099_v46, %v3074_v45  ;;  %v1157_v49 = vpop.f32.mrb[53].mxu0  ;;  %v1413_v50 = vpop.f32.mrb[53].mxu1 }
 0x1b3   : > { %2278 = vst.msk [vmem:[%s3797_s20 + $0xc4] sm:$0xf] %vm2228_vm3, %v2806_v6  ;;  %2342 = vst.msk [vmem:[%s3797_s20 + $0x1c4] sm:$0xf] %vm2228_vm3, %v2870_v43  ;;  %v1512_v51 = vadd.f32 %v4099_v46, %v1157_v49  ;;  %v1576_v52 = vadd.f32 %v4099_v46, %v1413_v50  ;;  %v3011_v53 = vpop.f32.mrb[54].mxu0  ;;  %v3075_v54 = vpop.f32.mrb[54].mxu1 }
 0x1b4   : > { %v1642_v55 = vmax.f32 %v1514_v47, 0.0  ;;  %v1706_v56 = vmax.f32 %v1578_v48, 0.0  ;;  %v1515_v57 = vadd.f32 %v4099_v46, %v3011_v53  ;;  %v1579_v58 = vadd.f32 %v4099_v46, %v3075_v54  ;;  %v1160_v59 = vpop.f32.mrb[55].mxu0  ;;  %v1416_v60 = vpop.f32.mrb[55].mxu1 }
 0x1b5   : > { %v1640_v61 = vmax.f32 %v1512_v51, 0.0  ;;  %v1704_v62 = vmax.f32 %v1576_v52, 0.0  ;;  %v1513_v63 = vadd.f32 %v4099_v46, %v1160_v59  ;;  %v1577_v0 = vadd.f32 %v4099_v46, %v1416_v60 }
 0x1b6   : > { %v2811_v1 = vpack.c.bf16 %v1642_v55, %v1642_v55  ;;  %v2875_v2 = vpack.c.bf16 %v1706_v56, %v1706_v56  ;;  %v1643_v3 = vmax.f32 %v1515_v57, 0.0  ;;  %v1707_v4 = vmax.f32 %v1579_v58, 0.0 }
 0x1b7   : > { %v2809_v5 = vpack.c.bf16 %v1640_v61, %v1640_v61  ;;  %v2873_v7 = vpack.c.bf16 %v1704_v62, %v1704_v62  ;;  %v1641_v8 = vmax.f32 %v1513_v63, 0.0  ;;  %v1705_v9 = vmax.f32 %v1577_v0, 0.0 }
 0x1b8   : > { %2283 = vst.msk [vmem:[%s3797_s20 + $0xd8] sm:$0xf] %vm2228_vm3, %v2811_v1  ;;  %2347 = vst.msk [vmem:[%s3797_s20 + $0x1d8] sm:$0xf] %vm2228_vm3, %v2875_v2  ;;  %v2812_v10 = vpack.c.bf16 %v1643_v3, %v1643_v3  ;;  %v2876_v11 = vpack.c.bf16 %v1707_v4, %v1707_v4 }
 0x1b9   : > { %2281 = vst.msk [vmem:[%s3797_s20 + $0xd0] sm:$0xf] %vm2228_vm3, %v2809_v5  ;;  %2345 = vst.msk [vmem:[%s3797_s20 + $0x1d0] sm:$0xf] %vm2228_vm3, %v2873_v7  ;;  %v2810_v12 = vpack.c.bf16 %v1641_v8, %v1641_v8  ;;  %v2874_v13 = vpack.c.bf16 %v1705_v9, %v1705_v9  ;;  %v3014_v14 = vpop.f32.mrb[56].mxu0  ;;  %v3078_v15 = vpop.f32.mrb[56].mxu1 }
 0x1ba   : > { %2284 = vst.msk [vmem:[%s3797_s20 + $0xdc] sm:$0xf] %vm2228_vm3, %v2812_v10  ;;  %2348 = vst.msk [vmem:[%s3797_s20 + $0x1dc] sm:$0xf] %vm2228_vm3, %v2876_v11  ;;  %v1518_v16 = vadd.f32 %v4099_v46, %v3014_v14  ;;  %v1582_v17 = vadd.f32 %v4099_v46, %v3078_v15  ;;  %v1173_v18 = vpop.f32.mrb[57].mxu0  ;;  %v1429_v19 = vpop.f32.mrb[57].mxu1 }
 0x1bb   : > { %2282 = vst.msk [vmem:[%s3797_s20 + $0xd4] sm:$0xf] %vm2228_vm3, %v2810_v12  ;;  %2346 = vst.msk [vmem:[%s3797_s20 + $0x1d4] sm:$0xf] %vm2228_vm3, %v2874_v13  ;;  %v1516_v20 = vadd.f32 %v4099_v46, %v1173_v18  ;;  %v1580_v21 = vadd.f32 %v4099_v46, %v1429_v19  ;;  %v3015_v22 = vpop.f32.mrb[58].mxu0  ;;  %v3079_v23 = vpop.f32.mrb[58].mxu1 }
 0x1bc   : > { %v1646_v24 = vmax.f32 %v1518_v16, 0.0  ;;  %v1710_v25 = vmax.f32 %v1582_v17, 0.0  ;;  %v1519_v26 = vadd.f32 %v4099_v46, %v3015_v22  ;;  %v1583_v27 = vadd.f32 %v4099_v46, %v3079_v23  ;;  %v1176_v28 = vpop.f32.mrb[59].mxu0  ;;  %v1432_v29 = vpop.f32.mrb[59].mxu1 }
 0x1bd   : > { %v1644_v30 = vmax.f32 %v1516_v20, 0.0  ;;  %v1708_v31 = vmax.f32 %v1580_v21, 0.0  ;;  %v1517_v32 = vadd.f32 %v4099_v46, %v1176_v28  ;;  %v1581_v33 = vadd.f32 %v4099_v46, %v1432_v29 }
 0x1be   : > { %v2815_v34 = vpack.c.bf16 %v1646_v24, %v1646_v24  ;;  %v2879_v35 = vpack.c.bf16 %v1710_v25, %v1710_v25  ;;  %v1647_v36 = vmax.f32 %v1519_v26, 0.0  ;;  %v1711_v37 = vmax.f32 %v1583_v27, 0.0 }
 0x1bf   : > { %v2813_v38 = vpack.c.bf16 %v1644_v30, %v1644_v30  ;;  %v2877_v39 = vpack.c.bf16 %v1708_v31, %v1708_v31  ;;  %v1645_v40 = vmax.f32 %v1517_v32, 0.0  ;;  %v1709_v41 = vmax.f32 %v1581_v33, 0.0 }
 0x1c0   : > { %2287 = vst.msk [vmem:[%s3797_s20 + $0xe8] sm:$0xf] %vm2228_vm3, %v2815_v34  ;;  %2351 = vst.msk [vmem:[%s3797_s20 + $0x1e8] sm:$0xf] %vm2228_vm3, %v2879_v35  ;;  %v2816_v42 = vpack.c.bf16 %v1647_v36, %v1647_v36  ;;  %v2880_v6 = vpack.c.bf16 %v1711_v37, %v1711_v37 }
 0x1c1   : > { %2285 = vst.msk [vmem:[%s3797_s20 + $0xe0] sm:$0xf] %vm2228_vm3, %v2813_v38  ;;  %2349 = vst.msk [vmem:[%s3797_s20 + $0x1e0] sm:$0xf] %vm2228_vm3, %v2877_v39  ;;  %v2814_v43 = vpack.c.bf16 %v1645_v40, %v1645_v40  ;;  %v2878_v44 = vpack.c.bf16 %v1709_v41, %v1709_v41  ;;  %v3018_v45 = vpop.f32.mrb[60].mxu0  ;;  %v3082_v47 = vpop.f32.mrb[60].mxu1 }
 0x1c2   : > { %2288 = vst.msk [vmem:[%s3797_s20 + $0xec] sm:$0xf] %vm2228_vm3, %v2816_v42  ;;  %2352 = vst.msk [vmem:[%s3797_s20 + $0x1ec] sm:$0xf] %vm2228_vm3, %v2880_v6  ;;  %v1522_v48 = vadd.f32 %v4099_v46, %v3018_v45  ;;  %v1586_v49 = vadd.f32 %v4099_v46, %v3082_v47  ;;  %v1189_v50 = vpop.f32.mrb[61].mxu0  ;;  %v1445_v51 = vpop.f32.mrb[61].mxu1 }
 0x1c3   : > { %2286 = vst.msk [vmem:[%s3797_s20 + $0xe4] sm:$0xf] %vm2228_vm3, %v2814_v43  ;;  %2350 = vst.msk [vmem:[%s3797_s20 + $0x1e4] sm:$0xf] %vm2228_vm3, %v2878_v44  ;;  %v1520_v52 = vadd.f32 %v4099_v46, %v1189_v50  ;;  %v1584_v53 = vadd.f32 %v4099_v46, %v1445_v51  ;;  %v3019_v54 = vpop.f32.mrb[62].mxu0  ;;  %v3083_v55 = vpop.f32.mrb[62].mxu1 }
 0x1c4   : > { %v1650_v56 = vmax.f32 %v1522_v48, 0.0  ;;  %v1714_v57 = vmax.f32 %v1586_v49, 0.0  ;;  %v1523_v58 = vadd.f32 %v4099_v46, %v3019_v54  ;;  %v1587_v59 = vadd.f32 %v4099_v46, %v3083_v55  ;;  %v1192_v60 = vpop.f32.mrb[63].mxu0  ;;  %v1448_v61 = vpop.f32.mrb[63].mxu1 }
 0x1c5   : > { %v1648_v62 = vmax.f32 %v1520_v52, 0.0  ;;  %v1712_v63 = vmax.f32 %v1584_v53, 0.0  ;;  %v1521_v0 = vadd.f32 %v4099_v46, %v1192_v60  ;;  %v1585_v1 = vadd.f32 %v4099_v46, %v1448_v61 }
 0x1c6   : > { %v2819_v2 = vpack.c.bf16 %v1650_v56, %v1650_v56  ;;  %v2883_v3 = vpack.c.bf16 %v1714_v57, %v1714_v57  ;;  %v1651_v4 = vmax.f32 %v1523_v58, 0.0  ;;  %v1715_v5 = vmax.f32 %v1587_v59, 0.0 }
 0x1c7   : > { %v2817_v7 = vpack.c.bf16 %v1648_v62, %v1648_v62  ;;  %v2881_v8 = vpack.c.bf16 %v1712_v63, %v1712_v63  ;;  %v1649_v9 = vmax.f32 %v1521_v0, 0.0  ;;  %v1713_v10 = vmax.f32 %v1585_v1, 0.0 }
 0x1c8   : > { %2291 = vst.msk [vmem:[%s3797_s20 + $0xf8] sm:$0xf] %vm2228_vm3, %v2819_v2  ;;  %2355 = vst.msk [vmem:[%s3797_s20 + $0x1f8] sm:$0xf] %vm2228_vm3, %v2883_v3  ;;  %v2820_v46 = vpack.c.bf16 %v1651_v4, %v1651_v4  ;;  %v2884_v11 = vpack.c.bf16 %v1715_v5, %v1715_v5 }
 0x1c9   : > { %2289 = vst.msk [vmem:[%s3797_s20 + $0xf0] sm:$0xf] %vm2228_vm3, %v2817_v7  ;;  %2353 = vst.msk [vmem:[%s3797_s20 + $0x1f0] sm:$0xf] %vm2228_vm3, %v2881_v8  ;;  %v2818_v12 = vpack.c.bf16 %v1649_v9, %v1649_v9  ;;  %v2882_v13 = vpack.c.bf16 %v1713_v10, %v1713_v10 }
 0x1ca   : > { %2292 = vst.msk [vmem:[%s3797_s20 + $0xfc] sm:$0xf] %vm2228_vm3, %v2820_v46  ;;  %2356 = vst.msk [vmem:[%s3797_s20 + $0x1fc] sm:$0xf] %vm2228_vm3, %v2884_v11 }
 0x1cb   : > { %2290 = vst.msk [vmem:[%s3797_s20 + $0xf4] sm:$0xf] %vm2228_vm3, %v2818_v12  ;;  %2354 = vst.msk [vmem:[%s3797_s20 + $0x1f4] sm:$0xf] %vm2228_vm3, %v2882_v13 }
 0x1cc   : > { %3342 = shalt.err (!%p3339_p11)
}
 0x1cd   : > { %s3343_s21 = scalar_lea.hbm %s4170_s18, 8192  ;;  %s3347_s5 = scalar_lea.hbm %s4236_s3, 16384 }
 0x1ce   : > { %p3344_p0 = scmp.ne.s32.totalorder %s4170_s18, %s3343_s21  ;;  %p3348_p6 = scmp.lt.u32.totalorder %s4170_s18, %s4236_s3 }
 0x1cf   : > { %p3349_p7 = scmp.lt.u32.totalorder %s3347_s5, %s3343_s21  ;;  %p3351_p8 = scmp.lt.u32.totalorder %s3343_s21, %s4170_s18 }
 0x1d0   : > { %p3345_p4 = pnand %p3344_p0, %p4251_p12 }
 0x1d1   : > { %p3350_p2 = por %p3349_p7, %p3348_p6 }
 0x1d2   : > { %p3346_p13 = pneg %p3345_p4 }
 0x1d3   : > { %p3352_p1 = por %p3351_p8, %p3350_p2 }
 0x1d5   : > { %p3353_p10 = pnand %p3352_p1, %p3346_p13 }
 0x1d7   : > { %3356 = shalt.err (!%p3353_p10)
}
 0x1d8   : > { %s3424_s20 = smov 64   ;;  %s3425_s22 = smov 4  }
 0x1d9   : > { %3098 = dma.vmem_to_hbm [thread:$0]  (%p4251_p12), %s4172_s24, 8192, %s4170_s18, %s2358_s26, %s3424_s20, %s3424_s20, %s3425_s22  }
 0x1da PF: > { %s2387_s15 = sand.u32 1, %s3395_s12   ;;  %p4252_p3 = scmp.ne.s32.totalorder %s4244_s23, 0 }
 0x1db   : > { %p4253_p5 = scmp.ge.s32.totalorder %s3415_s17, 2  ;;  %s2388_s11 = scalar_lea.sflag [#allocation4], %s2387_s15 }
 0x1dd   : > { %p3112_p9 = pnand %p4253_p5, %p4252_p3 }
 0x1df   : > { %3390 = dma.done.wait (!%p3112_p9), %s2388_s11, 8192  }
 0x1e0   : > { %3392 = vsyncadd (!%p3112_p9), %s2388_s11, 4294959104  ;;  %s20_s17 = sadd.s32 1, %s3415_s17   ;;  %s4254_s12 = smov %s3399_s13 }
 0x1e1   : > { %p17_p11 = scmp.ge.s32.totalorder %s20_s17, 4   ;;  %s4255_s13 = smov %s3403_s14 }
 0x1e2   : > { %s4256_s14 = smov %s3592_s6  ;;  %s4257_s15 = smov %s3411_s16 }
 0x1e3   : > { %s4258_s16 = smov %s4260_s25  ;;  %19 = sbr.rel (!%p17_p11) target bundleno = 7 (0x7), region = 87 }
 0x1ea   :  { %2393 = vsyncpa [#allocation3], 1 }
 0x1eb   :  { %2395 = vsyncpa [#allocation3 + $0x1], 1 }
 0x1ec   :  { %2396 = vsyncpa [#allocation6], 1 }
 0x1ed   :  { %2397 = vsyncpa [#allocation4], 1 }
 0x1ee   :  { %2399 = vsyncpa [#allocation4 + $0x1], 1 }

</bundles_post_ra>
